<compile_context>
chip_gen: v7x
topology: tpu7x:2x2x1
jax: 0.10.0
libtpu: 0.0.40
codegen_flags: <defaults>
</compile_context>

<pallas_src>
import functools
import math

import jax
import jax.numpy as jnp
from jax.experimental import pallas as pl
from jax.experimental.pallas import tpu as pltpu

_LANE = 128


def _round_up(n, m):
    return ((n + m - 1) // m) * m


def _pad2d(a, rows, cols):
    return jnp.pad(a, ((0, rows - a.shape[0]), (0, cols - a.shape[1])))


# ---------------------------------------------------------------------------
# Fused, row-tiled Pallas kernel
#   phase 0            : h0 = relu(x @ W0 + b0)            (per row tile)
#   phase p = 1..L     : h  = relu((adj' @ h) + alpha*h0) @ ...  conv layer p
#   phase p = L (also) : out = log_softmax(h @ W1 + b1)     (fused epilogue)
# ---------------------------------------------------------------------------

def _gcnii_kernel(resw_ref, adj_ref, x_ref, fc0w_ref, fc0b_ref, convw_ref,
                  fc1w_ref, fc1b_ref, o_ref, h_ref, h0_ref,
                  *, tm, alpha, num_classes):
    p = pl.program_id(0)                 # phase: 0 = fc0, 1..L = conv layers
    i = pl.program_id(1)                 # row tile
    last = pl.num_programs(0) - 1
    row0 = pl.multiple_of(i * tm, tm)
    rows = pl.ds(row0, tm)

    # ---- phase 0: fcs[0] + relu -------------------------------------------
    @pl.when(p == 0)
    def _():
        h0 = jnp.dot(x_ref[...], fc0w_ref[...],
                     preferred_element_type=jnp.float32)
        h0 = jnp.maximum(h0 + fc0b_ref[...], 0.0)
        h_ref[0, rows, :] = h0.astype(jnp.bfloat16)          # initial h
        h0_ref[rows, :] = (alpha * h0).astype(jnp.bfloat16)  # alpha-pre-scaled

    # ---- phases 1..L: GCNII conv layer p ------------------------------------
    @pl.when(p > 0)
    def _():
        rd = (p + 1) % 2          # slot holding h from the previous phase
        wr = p % 2                # slot receiving this phase's h
        # hi = (1-alpha) * adj @ h   (scale folded into adj_ref in the wrapper)
        hi = jnp.dot(adj_ref[...], h_ref[rd],
                     preferred_element_type=jnp.float32)
        support = hi + h0_ref[rows, :].astype(jnp.float32)
        # theta_l is folded into convw (bf16 MXU); residual stays f32 on VPU.
        y = jnp.dot(support.astype(jnp.bfloat16), convw_ref[0],
                    preferred_element_type=jnp.float32)
        out = y + resw_ref[p] * support
        h_ref[wr, rows, :] = jnp.maximum(out, 0.0).astype(jnp.bfloat16)

    # ---- output block: zeros until the final phase ---------------------------
    @pl.when(p < last)
    def _():
        o_ref[...] = jnp.zeros_like(o_ref)

    # ---- final phase: fcs[1] + log_softmax (fused epilogue) ------------------
    @pl.when(p == last)
    def _():
        wr = p % 2
        h = h_ref[wr, rows, :]
        y = jnp.dot(h, fc1w_ref[...], preferred_element_type=jnp.float32)
        y = y + fc1b_ref[...]
        lane = jax.lax.broadcasted_iota(jnp.int32, y.shape, 1)
        y = jnp.where(lane < num_classes, y, -1e30)   # mask padded class lanes
        m = jnp.max(y, axis=1, keepdims=True)
        z = y - m
        lse = jnp.log(jnp.sum(jnp.exp(z), axis=1, keepdims=True))
        o_ref[...] = (z - lse).astype(o_ref.dtype)


# ---------------------------------------------------------------------------
# gcn_norm (self-loops + symmetric normalization) as a dense adjacency.
# `scale` / `dtype` let the wrapper fold (1-alpha) and emit bf16 directly.
# ---------------------------------------------------------------------------

def gcn_norm_dense(edge_index, num_nodes, padded_nodes=None, scale=1.0,
                   dtype=jnp.float32):
    padded = num_nodes if padded_nodes is None else padded_nodes
    row, col = edge_index[0], edge_index[1]
    loop = jnp.arange(num_nodes, dtype=edge_index.dtype)
    row = jnp.concatenate([row, loop])
    col = jnp.concatenate([col, loop])
    w = jnp.ones(row.shape[0], jnp.float32)
    deg = jnp.zeros(num_nodes, jnp.float32).at[col].add(w)
    dinv = jnp.where(deg > 0.0, jax.lax.rsqrt(deg), 0.0)
    norm = (scale * dinv[row] * w * dinv[col]).astype(dtype)
    return jnp.zeros((padded, padded), dtype).at[row, col].add(norm)


# ---------------------------------------------------------------------------
# Parameter init (deterministic, matches shapes in GCNII.__init__)
# ---------------------------------------------------------------------------

def init_params(key, in_channels, hidden_channels, out_channels, num_layers):
    keys = jax.random.split(key, 4 + num_layers)
    b0 = 1.0 / math.sqrt(in_channels)
    fc0_w = jax.random.uniform(keys[0], (in_channels, hidden_channels),
                               jnp.float32, -b0, b0)
    fc0_b = jax.random.uniform(keys[1], (1, hidden_channels),
                               jnp.float32, -b0, b0)
    b1 = 1.0 / math.sqrt(hidden_channels)
    fc1_w = jax.random.uniform(keys[2], (hidden_channels, out_channels),
                               jnp.float32, -b1, b1)
    fc1_b = jax.random.uniform(keys[3], (1, out_channels),
                               jnp.float32, -b1, b1)
    stdv = 1.0 / math.sqrt(hidden_channels)
    conv_w = [jax.random.uniform(keys[4 + i],
                                 (hidden_channels, hidden_channels),
                                 jnp.float32, -stdv, stdv)
              for i in range(num_layers)]
    return dict(fc0_w=fc0_w, fc0_b=fc0_b, fc1_w=fc1_w, fc1_b=fc1_b,
                conv_w=conv_w)


# ---------------------------------------------------------------------------
# VMEM budget for the resident set (tiles double-buffered, + scratch)
# ---------------------------------------------------------------------------

def _vmem_budget(tm, np_, fp, hp, cp):
    bf, f4 = 2, 4
    b = 0
    b += 2 * tm * np_ * bf       # adj row tile (double buffered)
    b += 2 * tm * fp * bf        # x row tile
    b += fp * hp * bf            # fc0 weight
    b += 8 * hp * f4             # fc0 bias (sublane padded)
    b += 2 * hp * hp * bf        # per-layer conv weight (double buffered)
    b += hp * cp * bf            # fc1 weight
    b += 8 * cp * f4             # fc1 bias
    b += 2 * tm * cp * f4        # out tile (double buffered)
    b += 2 * np_ * hp * bf       # h ping-pong scratch
    b += np_ * hp * bf           # h0 scratch
    return b


# ---------------------------------------------------------------------------
# Wrapper: fold scalars, pad to lane/sublane-dense layout, one pallas_call
# ---------------------------------------------------------------------------

def gcnii_forward(x, edge_index, params, num_layers=2, lamda=1.0, alpha=0.1):
    N, f_in = x.shape
    hidden = params["fc0_w"].shape[1]
    n_cls = params["fc1_w"].shape[1]

    Fp = _round_up(f_in, _LANE)
    Hp = _round_up(hidden, _LANE)
    Cp = _round_up(n_cls, _LANE)

    tm = min(128, _round_up(N, 16))     # row tile (bf16 sublane aligned)
    Np = _round_up(N, tm)
    nt = Np // tm

    # Dense normalized adjacency with (1-alpha) folded in, emitted as bf16.
    adj_s = gcn_norm_dense(edge_index, N, padded_nodes=Np,
                           scale=(1.0 - alpha), dtype=jnp.bfloat16)

    # dropout (eval mode) -> identity.  Lane/sublane-dense padded operands.
    x_p = _pad2d(x, Np, Fp).astype(jnp.bfloat16)
    fc0w = _pad2d(params["fc0_w"], Fp, Hp).astype(jnp.bfloat16)
    fc0b = _pad2d(params["fc0_b"], 1, Hp)
    fc1w = _pad2d(params["fc1_w"], Hp, Cp).astype(jnp.bfloat16)
    fc1b = _pad2d(params["fc1_b"], 1, Cp)

    # Fold theta_l into the conv weight (bf16 MXU path); keep (1-theta_l) as
    # an SMEM scalar so the residual add stays in f32 on the VPU.
    thetas = [math.log(lamda / (l + 1) + 1.0) for l in range(num_layers)]
    conv_w = jnp.stack([t * _pad2d(params["conv_w"][l], Hp, Hp)
                        for l, t in enumerate(thetas)]).astype(jnp.bfloat16)
    resw = jnp.array([0.0] + [1.0 - t for t in thetas], jnp.float32)

    nphase = num_layers + 1
    grid = (nphase, nt)

    kernel = functools.partial(_gcnii_kernel, tm=tm, alpha=float(alpha),
                               num_classes=n_cls)

    vmem_bytes = int(min(100 * 1024 * 1024,
                         max(2 * _vmem_budget(tm, Np, Fp, Hp, Cp) + (2 << 20),
                             16 << 20)))

    out = pl.pallas_call(
        kernel,
        out_shape=jax.ShapeDtypeStruct((Np, Cp), jnp.float32),
        grid=grid,
        in_specs=[
            pl.BlockSpec(memory_space=pltpu.MemorySpace.SMEM),         # resw
            pl.BlockSpec((tm, Np), lambda p, i: (i, 0)),               # adj row tile
            pl.BlockSpec((tm, Fp), lambda p, i: (i, 0)),               # x row tile
            pl.BlockSpec((Fp, Hp), lambda p, i: (0, 0)),               # fc0 W
            pl.BlockSpec((1, Hp), lambda p, i: (0, 0)),                # fc0 b
            pl.BlockSpec((1, Hp, Hp),
                         lambda p, i: (jnp.maximum(p - 1, 0), 0, 0)),  # conv W_l
            pl.BlockSpec((Hp, Cp), lambda p, i: (0, 0)),               # fc1 W
            pl.BlockSpec((1, Cp), lambda p, i: (0, 0)),                # fc1 b
        ],
        out_specs=pl.BlockSpec((tm, Cp), lambda p, i: (i, 0)),
        scratch_shapes=[pltpu.VMEM((2, Np, Hp), jnp.bfloat16),   # h ping-pong
                        pltpu.VMEM((Np, Hp), jnp.bfloat16)],     # alpha * h0
        compiler_params=pltpu.CompilerParams(
            dimension_semantics=("arbitrary", "arbitrary"),
            vmem_limit_bytes=vmem_bytes),
    )(resw, adj_s, x_p, fc0w, fc0b, conv_w, fc1w, fc1b)
    return out[:N, :n_cls]


# ---------------------------------------------------------------------------
# Pure-JAX f32 reference (matches the PyTorch eval-mode forward)
# ---------------------------------------------------------------------------

def gcnii_forward_ref(x, edge_index, params, num_layers=2, lamda=1.0,
                      alpha=0.1):
    adj = gcn_norm_dense(edge_index, x.shape[0])
    h = jax.nn.relu(x @ params["fc0_w"] + params["fc0_b"])
    h0 = h
    for i in range(num_layers):
        theta = math.log(lamda / (i + 1) + 1.0)
        hi = adj @ h
        support = (1.0 - alpha) * hi + alpha * h0
        h = jax.nn.relu(theta * (support @ params["conv_w"][i])
                        + (1.0 - theta) * support)
    y = h @ params["fc1_w"] + params["fc1_b"]
    return jax.nn.log_softmax(y, axis=1)


# ---------------------------------------------------------------------------
# Main
# ---------------------------------------------------------------------------

if __name__ == "__main__":
    N = 256               # nodes (2 row tiles of 128 -> exercises the grid)
    in_channels = 16
    hidden_channels = 64
    out_channels = 8
    num_layers = 3

    key = jax.random.PRNGKey(0)
    kx, kp = jax.random.split(key)

    x = jax.random.normal(kx, (N, in_channels), jnp.float32)

    # Undirected ring graph: edges (i, i+1 mod N) in both directions.
    src = jnp.arange(N, dtype=jnp.int32)
    dst = (src + 1) % N
    edge_index = jnp.stack([jnp.concatenate([src, dst]),
                            jnp.concatenate([dst, src])], axis=0)  # [2, 2N]

    params = init_params(kp, in_channels, hidden_channels, out_channels,
                         num_layers)

    out = gcnii_forward(x, edge_index, params,
                        num_layers=num_layers, lamda=1.0, alpha=0.1)
    out = jax.block_until_ready(out)

    assert out.shape == (N, out_channels)
    assert bool(jnp.all(jnp.isfinite(out)))
    # rows of log_softmax must exp-sum to ~1
    assert jnp.allclose(jnp.sum(jnp.exp(out), axis=1), 1.0, atol=1e-3)
    # match the f32 reference within bf16-matmul tolerance
    ref = gcnii_forward_ref(x, edge_index, params,
                            num_layers=num_layers, lamda=1.0, alpha=0.1)
    err = float(jnp.max(jnp.abs(out - ref)))
    assert err < 5e-2, err

    print("KERNEL_OK")
</pallas_src>

<mosaic_0001>
module attributes {stable_mosaic.version = 11 : i64} {
  func.func @_gcnii_kernel(%arg0: i32, %arg1: i32, %arg2: memref<4xf32, #tpu.memory_space<smem>>, %arg3: memref<128x256xbf16, #tpu.memory_space<vmem>>, %arg4: memref<128x128xbf16, #tpu.memory_space<vmem>>, %arg5: memref<128x128xbf16, #tpu.memory_space<vmem>>, %arg6: memref<1x128xf32, #tpu.memory_space<vmem>>, %arg7: memref<1x128x128xbf16, #tpu.memory_space<vmem>>, %arg8: memref<128x128xbf16, #tpu.memory_space<vmem>>, %arg9: memref<1x128xf32, #tpu.memory_space<vmem>>, %arg10: memref<128x128xf32, #tpu.memory_space<vmem>>, %arg11: memref<2x256x128xbf16, #tpu.memory_space<vmem>>, %arg12: memref<256x128xbf16, #tpu.memory_space<vmem>>) attributes {dimension_semantics = [#tpu.dimension_semantics<arbitrary>, #tpu.dimension_semantics<arbitrary>], iteration_bounds = array<i64: 4, 2>, scalar_prefetch = 0 : i64, scratch_operands = 2 : i64, tpu.core_type = #tpu.core_type<tc>, window_params = [{transform_indices = @transform_0, window_bounds = array<i64: 4>}, {transform_indices = @transform_1, window_bounds = array<i64: 128, 256>}, {transform_indices = @transform_2, window_bounds = array<i64: 128, 128>}, {pipeline_mode = #tpu.pipeline_mode<synchronous>, transform_indices = @transform_3, window_bounds = array<i64: 128, 128>}, {pipeline_mode = #tpu.pipeline_mode<synchronous>, transform_indices = @transform_4, window_bounds = array<i64: 1, 128>}, {transform_indices = @transform_5, window_bounds = array<i64: 1, 128, 128>}, {pipeline_mode = #tpu.pipeline_mode<synchronous>, transform_indices = @transform_6, window_bounds = array<i64: 128, 128>}, {pipeline_mode = #tpu.pipeline_mode<synchronous>, transform_indices = @transform_7, window_bounds = array<i64: 1, 128>}, {transform_indices = @transform_8, window_bounds = array<i64: 128, 128>}]} {
    %c128_i32 = arith.constant 128 : i32
    %0 = arith.muli %arg1, %c128_i32 : i32
    %1 = tpu.assume_multiple %0, 128 : i32
    %c0_i32 = arith.constant 0 : i32
    %2 = arith.cmpi eq, %arg0, %c0_i32 : i32
    %3 = arith.extui %2 : i1 to i32
    %c0_i32_0 = arith.constant 0 : i32
    %4 = arith.cmpi ne, %3, %c0_i32_0 : i32
    scf.if %4 {
      %c0 = arith.constant 0 : index
      %c0_6 = arith.constant 0 : index
      %14 = vector.load %arg4[%c0, %c0_6] : memref<128x128xbf16, #tpu.memory_space<vmem>>, vector<128x128xbf16>
      %c0_7 = arith.constant 0 : index
      %c0_8 = arith.constant 0 : index
      %15 = vector.load %arg5[%c0_7, %c0_8] : memref<128x128xbf16, #tpu.memory_space<vmem>>, vector<128x128xbf16>
      %cst = arith.constant dense<0.000000e+00> : vector<128x128xf32>
      %16 = tpu.matmul %14, %15, %cst {dimension_numbers = #tpu.dot_dimension_numbers<[1], [0], [0], [1], [0, 0, 1, 1], [], []>} : vector<128x128xbf16>, vector<128x128xbf16>, vector<128x128xf32> -> vector<128x128xf32>
      %c0_9 = arith.constant 0 : index
      %c0_10 = arith.constant 0 : index
      %17 = vector.load %arg6[%c0_9, %c0_10] : memref<1x128xf32, #tpu.memory_space<vmem>>, vector<1x128xf32>
      %18 = vector.broadcast %17 : vector<1x128xf32> to vector<128x128xf32>
      %19 = arith.addf %16, %18 : vector<128x128xf32>
      %cst_11 = arith.constant 0.000000e+00 : f32
      %20 = vector.broadcast %cst_11 : f32 to vector<128x128xf32>
      %21 = arith.maximumf %19, %20 : vector<128x128xf32>
      %22 = arith.truncf %21 : vector<128x128xf32> to vector<128x128xbf16>
      %c0_12 = arith.constant 0 : index
      %23 = arith.index_cast %1 : i32 to index
      %c0_13 = arith.constant 0 : index
      %24 = vector.load %arg11[%c0_12, %23, %c0_13] : memref<2x256x128xbf16, #tpu.memory_space<vmem>>, vector<1x128x128xbf16>
      %25 = vector.shape_cast %24 : vector<1x128x128xbf16> to vector<128x128xbf16>
      %26 = vector.shape_cast %22 : vector<128x128xbf16> to vector<1x128x128xbf16>
      tpu.vector_store %arg11[%c0_12, %23, %c0_13], %26 {strides = array<i32>} : memref<2x256x128xbf16, #tpu.memory_space<vmem>>, vector<1x128x128xbf16>,
      %cst_14 = arith.constant 1.000000e-01 : f32
      %27 = vector.broadcast %cst_14 : f32 to vector<128x128xf32>
      %28 = arith.mulf %27, %21 : vector<128x128xf32>
      %29 = arith.truncf %28 : vector<128x128xf32> to vector<128x128xbf16>
      %30 = arith.index_cast %1 : i32 to index
      %c0_15 = arith.constant 0 : index
      %31 = vector.load %arg12[%30, %c0_15] : memref<256x128xbf16, #tpu.memory_space<vmem>>, vector<128x128xbf16>
      tpu.vector_store %arg12[%30, %c0_15], %29 {strides = array<i32>} : memref<256x128xbf16, #tpu.memory_space<vmem>>, vector<128x128xbf16>,
    } else {
    }
    %c0_i32_1 = arith.constant 0 : i32
    %5 = arith.cmpi sgt, %arg0, %c0_i32_1 : i32
    %6 = arith.extui %5 : i1 to i32
    %c0_i32_2 = arith.constant 0 : i32
    %7 = arith.cmpi ne, %6, %c0_i32_2 : i32
    scf.if %7 {
      %c1_i32 = arith.constant 1 : i32
      %14 = arith.addi %arg0, %c1_i32 : i32
      %c2_i32 = arith.constant 2 : i32
      %c0_i32_6 = arith.constant 0 : i32
      %15 = arith.cmpi eq, %c2_i32, %c0_i32_6 : i32
      %c1_i32_7 = arith.constant 1 : i32
      %16 = arith.select %15, %c1_i32_7, %c2_i32 : i32
      %17 = arith.remsi %14, %16 : i32
      %c0_i32_8 = arith.constant 0 : i32
      %18 = arith.cmpi ne, %17, %c0_i32_8 : i32
      %c0_i32_9 = arith.constant 0 : i32
      %19 = arith.cmpi slt, %17, %c0_i32_9 : i32
      %c0_i32_10 = arith.constant 0 : i32
      %20 = arith.cmpi slt, %16, %c0_i32_10 : i32
      %21 = arith.xori %19, %20 : i1
      %22 = arith.andi %21, %18 : i1
      %23 = arith.addi %17, %16 : i32
      %24 = arith.select %22, %23, %17 : i32
      %c2_i32_11 = arith.constant 2 : i32
      %c0_i32_12 = arith.constant 0 : i32
      %25 = arith.cmpi eq, %c2_i32_11, %c0_i32_12 : i32
      %c1_i32_13 = arith.constant 1 : i32
      %26 = arith.select %25, %c1_i32_13, %c2_i32_11 : i32
      %27 = arith.remsi %arg0, %26 : i32
      %c0_i32_14 = arith.constant 0 : i32
      %28 = arith.cmpi ne, %27, %c0_i32_14 : i32
      %c0_i32_15 = arith.constant 0 : i32
      %29 = arith.cmpi slt, %27, %c0_i32_15 : i32
      %c0_i32_16 = arith.constant 0 : i32
      %30 = arith.cmpi slt, %26, %c0_i32_16 : i32
      %31 = arith.xori %29, %30 : i1
      %32 = arith.andi %31, %28 : i1
      %33 = arith.addi %27, %26 : i32
      %34 = arith.select %32, %33, %27 : i32
      %c0 = arith.constant 0 : index
      %c0_17 = arith.constant 0 : index
      %35 = vector.load %arg3[%c0, %c0_17] : memref<128x256xbf16, #tpu.memory_space<vmem>>, vector<128x256xbf16>
      %36 = arith.index_cast %24 : i32 to index
      %c0_18 = arith.constant 0 : index
      %c0_19 = arith.constant 0 : index
      %37 = vector.load %arg11[%36, %c0_18, %c0_19] : memref<2x256x128xbf16, #tpu.memory_space<vmem>>, vector<1x256x128xbf16>
      %38 = vector.shape_cast %37 : vector<1x256x128xbf16> to vector<256x128xbf16>
      %cst = arith.constant dense<0.000000e+00> : vector<128x128xf32>
      %39 = tpu.matmul %35, %38, %cst {dimension_numbers = #tpu.dot_dimension_numbers<[1], [0], [0], [1], [0, 0, 1, 1], [], []>} : vector<128x256xbf16>, vector<256x128xbf16>, vector<128x128xf32> -> vector<128x128xf32>
      %40 = arith.index_cast %1 : i32 to index
      %c0_20 = arith.constant 0 : index
      %41 = vector.load %arg12[%40, %c0_20] : memref<256x128xbf16, #tpu.memory_space<vmem>>, vector<128x128xbf16>
      %42 = arith.extf %41 : vector<128x128xbf16> to vector<128x128xf32>
      %43 = arith.addf %39, %42 : vector<128x128xf32>
      %44 = arith.truncf %43 : vector<128x128xf32> to vector<128x128xbf16>
      %c0_21 = arith.constant 0 : index
      %c0_22 = arith.constant 0 : index
      %c0_23 = arith.constant 0 : index
      %45 = vector.load %arg7[%c0_21, %c0_22, %c0_23] : memref<1x128x128xbf16, #tpu.memory_space<vmem>>, vector<1x128x128xbf16>
      %46 = vector.shape_cast %45 : vector<1x128x128xbf16> to vector<128x128xbf16>
      %cst_24 = arith.constant dense<0.000000e+00> : vector<128x128xf32>
      %47 = tpu.matmul %44, %46, %cst_24 {dimension_numbers = #tpu.dot_dimension_numbers<[1], [0], [0], [1], [0, 0, 1, 1], [], []>} : vector<128x128xbf16>, vector<128x128xbf16>, vector<128x128xf32> -> vector<128x128xf32>
      %48 = arith.index_cast %arg0 : i32 to index
      %49 = memref.load %arg2[%48] : memref<4xf32, #tpu.memory_space<smem>>
      %50 = vector.broadcast %49 : f32 to vector<128x128xf32>
      %51 = arith.mulf %50, %43 : vector<128x128xf32>
      %52 = arith.addf %47, %51 : vector<128x128xf32>
      %cst_25 = arith.constant 0.000000e+00 : f32
      %53 = vector.broadcast %cst_25 : f32 to vector<128x128xf32>
      %54 = arith.maximumf %52, %53 : vector<128x128xf32>
      %55 = arith.truncf %54 : vector<128x128xf32> to vector<128x128xbf16>
      %56 = arith.index_cast %34 : i32 to index
      %57 = arith.index_cast %1 : i32 to index
      %c0_26 = arith.constant 0 : index
      %58 = vector.load %arg11[%56, %57, %c0_26] : memref<2x256x128xbf16, #tpu.memory_space<vmem>>, vector<1x128x128xbf16>
      %59 = vector.shape_cast %58 : vector<1x128x128xbf16> to vector<128x128xbf16>
      %60 = vector.shape_cast %55 : vector<128x128xbf16> to vector<1x128x128xbf16>
      tpu.vector_store %arg11[%56, %57, %c0_26], %60 {strides = array<i32>} : memref<2x256x128xbf16, #tpu.memory_space<vmem>>, vector<1x128x128xbf16>,
    } else {
    }
    %c3_i32 = arith.constant 3 : i32
    %8 = arith.cmpi slt, %arg0, %c3_i32 : i32
    %9 = arith.extui %8 : i1 to i32
    %c0_i32_3 = arith.constant 0 : i32
    %10 = arith.cmpi ne, %9, %c0_i32_3 : i32
    scf.if %10 {
      %cst = arith.constant 0.000000e+00 : f32
      %14 = vector.broadcast %cst : f32 to vector<128x128xf32>
      %c0 = arith.constant 0 : index
      %c0_6 = arith.constant 0 : index
      %15 = vector.load %arg10[%c0, %c0_6] : memref<128x128xf32, #tpu.memory_space<vmem>>, vector<128x128xf32>
      tpu.vector_store %arg10[%c0, %c0_6], %14 {strides = array<i32>} : memref<128x128xf32, #tpu.memory_space<vmem>>, vector<128x128xf32>,
    } else {
    }
    %c3_i32_4 = arith.constant 3 : i32
    %11 = arith.cmpi eq, %arg0, %c3_i32_4 : i32
    %12 = arith.extui %11 : i1 to i32
    %c0_i32_5 = arith.constant 0 : i32
    %13 = arith.cmpi ne, %12, %c0_i32_5 : i32
    scf.if %13 {
      %c2_i32 = arith.constant 2 : i32
      %c0_i32_6 = arith.constant 0 : i32
      %14 = arith.cmpi eq, %c2_i32, %c0_i32_6 : i32
      %c1_i32 = arith.constant 1 : i32
      %15 = arith.select %14, %c1_i32, %c2_i32 : i32
      %16 = arith.remsi %arg0, %15 : i32
      %c0_i32_7 = arith.constant 0 : i32
      %17 = arith.cmpi ne, %16, %c0_i32_7 : i32
      %c0_i32_8 = arith.constant 0 : i32
      %18 = arith.cmpi slt, %16, %c0_i32_8 : i32
      %c0_i32_9 = arith.constant 0 : i32
      %19 = arith.cmpi slt, %15, %c0_i32_9 : i32
      %20 = arith.xori %18, %19 : i1
      %21 = arith.andi %20, %17 : i1
      %22 = arith.addi %16, %15 : i32
      %23 = arith.select %21, %22, %16 : i32
      %24 = arith.index_cast %23 : i32 to index
      %25 = arith.index_cast %1 : i32 to index
      %c0 = arith.constant 0 : index
      %26 = vector.load %arg11[%24, %25, %c0] : memref<2x256x128xbf16, #tpu.memory_space<vmem>>, vector<1x128x128xbf16>
      %27 = vector.shape_cast %26 : vector<1x128x128xbf16> to vector<128x128xbf16>
      %c0_10 = arith.constant 0 : index
      %c0_11 = arith.constant 0 : index
      %28 = vector.load %arg8[%c0_10, %c0_11] : memref<128x128xbf16, #tpu.memory_space<vmem>>, vector<128x128xbf16>
      %cst = arith.constant dense<0.000000e+00> : vector<128x128xf32>
      %29 = tpu.matmul %27, %28, %cst {dimension_numbers = #tpu.dot_dimension_numbers<[1], [0], [0], [1], [0, 0, 1, 1], [], []>} : vector<128x128xbf16>, vector<128x128xbf16>, vector<128x128xf32> -> vector<128x128xf32>
      %c0_12 = arith.constant 0 : index
      %c0_13 = arith.constant 0 : index
      %30 = vector.load %arg9[%c0_12, %c0_13] : memref<1x128xf32, #tpu.memory_space<vmem>>, vector<1x128xf32>
      %31 = vector.broadcast %30 : vector<1x128xf32> to vector<128x128xf32>
      %32 = arith.addf %29, %31 : vector<128x128xf32>
      %33 = tpu.iota {dimensions = array<i32: 1>} : vector<128x128xi32>
      %c8_i32 = arith.constant 8 : i32
      %34 = vector.broadcast %c8_i32 : i32 to vector<128x128xi32>
      %35 = arith.cmpi slt, %33, %34 : vector<128x128xi32>
      %cst_14 = arith.constant -1.000000e+30 : f32
      %36 = vector.broadcast %cst_14 : f32 to vector<128x128xf32>
      %37 = arith.select %35, %32, %36 : vector<128x128xi1>, vector<128x128xf32>
      %cst_15 = arith.constant dense<0xFF800000> : vector<128xf32>
      %38 = vector.multi_reduction <maximumf>, %37, %cst_15 [1] : vector<128x128xf32> to vector<128xf32>
      %39 = vector.shape_cast %38 : vector<128xf32> to vector<128x1xf32>
      %40 = vector.broadcast %39 : vector<128x1xf32> to vector<128x128xf32>
      %41 = arith.subf %37, %40 : vector<128x128xf32>
      %42 = math.exp %41 : vector<128x128xf32>
      %cst_16 = arith.constant dense<0.000000e+00> : vector<128xf32>
      %43 = vector.multi_reduction <add>, %42, %cst_16 [1] : vector<128x128xf32> to vector<128xf32>
      %44 = vector.shape_cast %43 : vector<128xf32> to vector<128x1xf32>
      %45 = math.log %44 : vector<128x1xf32>
      %46 = vector.broadcast %45 : vector<128x1xf32> to vector<128x128xf32>
      %47 = arith.subf %41, %46 : vector<128x128xf32>
      %c0_17 = arith.constant 0 : index
      %c0_18 = arith.constant 0 : index
      %48 = vector.load %arg10[%c0_17, %c0_18] : memref<128x128xf32, #tpu.memory_space<vmem>>, vector<128x128xf32>
      tpu.vector_store %arg10[%c0_17, %c0_18], %47 {strides = array<i32>} : memref<128x128xf32, #tpu.memory_space<vmem>>, vector<128x128xf32>,
    } else {
    }
    return
  }
  func.func @transform_0(%arg0: i32, %arg1: i32) -> i32 {
    %c0_i32 = arith.constant 0 : i32
    %c0_i32_0 = arith.constant 0 : i32
    return %c0_i32 : i32
  }
  func.func @transform_1(%arg0: i32, %arg1: i32) -> (i32, i32) {
    %c0_i32 = arith.constant 0 : i32
    %c0_i32_0 = arith.constant 0 : i32
    return %arg1, %c0_i32 : i32, i32
  }
  func.func @transform_2(%arg0: i32, %arg1: i32) -> (i32, i32) {
    %c0_i32 = arith.constant 0 : i32
    %c0_i32_0 = arith.constant 0 : i32
    return %arg1, %c0_i32 : i32, i32
  }
  func.func @transform_3(%arg0: i32, %arg1: i32) -> (i32, i32) {
    %c0_i32 = arith.constant 0 : i32
    %c0_i32_0 = arith.constant 0 : i32
    %c0_i32_1 = arith.constant 0 : i32
    return %c0_i32, %c0_i32_0 : i32, i32
  }
  func.func @transform_4(%arg0: i32, %arg1: i32) -> (i32, i32) {
    %c0_i32 = arith.constant 0 : i32
    %c0_i32_0 = arith.constant 0 : i32
    %c0_i32_1 = arith.constant 0 : i32
    return %c0_i32, %c0_i32_0 : i32, i32
  }
  func.func @transform_5(%arg0: i32, %arg1: i32) -> (i32, i32, i32) {
    %c1_i32 = arith.constant 1 : i32
    %0 = arith.subi %arg0, %c1_i32 : i32
    %c0_i32 = arith.constant 0 : i32
    %1 = arith.maxsi %0, %c0_i32 : i32
    %c0_i32_0 = arith.constant 0 : i32
    %c0_i32_1 = arith.constant 0 : i32
    %c0_i32_2 = arith.constant 0 : i32
    return %1, %c0_i32_0, %c0_i32_1 : i32, i32, i32
  }
  func.func @transform_6(%arg0: i32, %arg1: i32) -> (i32, i32) {
    %c0_i32 = arith.constant 0 : i32
    %c0_i32_0 = arith.constant 0 : i32
    %c0_i32_1 = arith.constant 0 : i32
    return %c0_i32, %c0_i32_0 : i32, i32
  }
  func.func @transform_7(%arg0: i32, %arg1: i32) -> (i32, i32) {
    %c0_i32 = arith.constant 0 : i32
    %c0_i32_0 = arith.constant 0 : i32
    %c0_i32_1 = arith.constant 0 : i32
    return %c0_i32, %c0_i32_0 : i32, i32
  }
  func.func @transform_8(%arg0: i32, %arg1: i32) -> (i32, i32) {
    %c0_i32 = arith.constant 0 : i32
    %c0_i32_0 = arith.constant 0 : i32
    return %arg1, %c0_i32 : i32, i32
  }
}

</mosaic_0001>

<bundles_post_ra>
// kernel: tpu_custom_call.1
= control target key start
LH: loop header
LB: loop body
LE: loop exit
PB: predicated region body
PF: predicated region fallthrough
CT: control target
= control target key end

     0   :  { %s3690_s0 = inlined_call_operand.hbm [shape: f32[4], index: 0, kind: input, shape index: {}]   ;;  %s3691_s1 = inlined_call_operand.hbm [shape: bf16[256,256], index: 1, kind: input, shape index: {}]   ;;  %s3692_s2 = inlined_call_operand.hbm [shape: bf16[256,128], index: 2, kind: input, shape index: {}]   ;;  %s3693_s3 = inlined_call_operand.hbm [shape: bf16[128,128], index: 3, kind: input, shape index: {}]   ;;  %s3694_s4 = inlined_call_operand.vmem [shape: f32[1,128], index: 4, kind: input, shape index: {}]   ;;  %s3695_s5 = inlined_call_operand.hbm [shape: bf16[3,128,128], index: 5, kind: input, shape index: {}]   ;;  %s3696_s6 = inlined_call_operand.hbm [shape: bf16[128,128], index: 6, kind: input, shape index: {}]   ;;  %s3697_s7 = inlined_call_operand.vmem [shape: f32[1,128], index: 7, kind: input, shape index: {}]   ;;  %s3698_s8 = inlined_call_operand.hbm [shape: f32[256,128], index: 8, kind: output, shape index: {}]  }
   0x1   :  { %3718 = sst [smem:[#allocation30_spill]] %s3690_s0 }
   0x2   :  { %3719 = sst [smem:[#allocation31_spill]] %s3691_s1 }
   0x3   :  { %3720 = sst [smem:[#allocation32_spill]] %s3693_s3 }
   0x4   :  { %3721 = sst [smem:[#allocation33_spill]] %s3694_s4 }
   0x5   :  { %3722 = sst [smem:[#allocation34_spill]] %s3696_s6 }
   0x6   :  { %3723 = sst [smem:[#allocation35_spill]] %s3697_s7 }
   0x7   :  { %3724 = sst [smem:[#allocation36_spill]] %s3698_s8 }
   0x8   :  { %13 = vsyncpa [#allocation7], 0 }
   0x9   :  { %14 = vsyncpa [#allocation5], 0 }
   0xa   :  { %16 = vsyncpa [#allocation5 + $0x1], 0 }
   0xb   :  { %17 = vsyncpa [#allocation10], 0 }
   0xc   :  { %19 = vsyncpa [#allocation10 + $0x1], 0 }
   0xd   :  { %20 = vsyncpa [#allocation13], 0 }
   0xe   :  { %22 = vsyncpa [#allocation13 + $0x1], 0 }
   0xf   :  { %23 = vsyncpa [#allocation6], 0 }
  0x10   :  { %25 = vsyncpa [#allocation6 + $0x1], 0  ;;  %s2859_s27 = smov 0   ;;  %s2861_s28 = smov 0  }
  0x11   :  { %s2863_s29 = smov 0   ;;  %s2865_s30 = smov 0  }
  0x12   :  { %s2867_s9 = smov 0   ;;  %s2869_s10 = smov 0  }
  0x13   :  { %s2871_s11 = smov 0   ;;  %s2873_s12 = smov 0  }
  0x14   :  { %s2875_s13 = smov 0   ;;  %s2877_s14 = smov 0  }
  0x15   :  { %s2879_s15 = smov 0  }
  0x16 LB: > { %3725 = sst [smem:[#allocation23_spill]] %s2770_s30  ;;  %s2913_s16 = sadd.s32 4294967295, %s2798_s15   ;;  %s2798_s15 = sphi %s2879_s15, %s31_s15   ;;  %s2794_s14 = sphi %s2877_s14, %s3789_s14   ;;  %s2790_s13 = sphi %s2875_s13, %s3788_s13   ;;  %s2786_s12 = sphi %s2873_s12, %s3787_s12   ;;  %s2782_s11 = sphi %s2871_s11, %s3786_s11   ;;  %s2778_s10 = sphi %s2869_s10, %s3785_s10   ;;  %s2774_s9 = sphi %s2867_s9, %s3784_s9   ;;  %s2770_s30 = sphi %s2865_s30, %s3783_s30   ;;  %s2766_s29 = sphi %s2863_s29, %s3782_s29   ;;  %s2762_s28 = sphi %s2861_s28, %s3781_s28   ;;  %s2758_s27 = sphi %s2859_s27, %s3780_s27  }
  0x17   : > { %3726 = sst [smem:[#allocation24_spill]] %s2782_s11  ;;  %s1876_s17 = sadd.s32 4294967294, %s2798_s15  }
  0x18   : > { %3727 = sst [smem:[#allocation25_spill]] %s2786_s12  ;;  %p84_p0 = scmp.ne.s32.totalorder %s2774_s9, %s2770_s30 }
  0x19   : > { %p3702_p1 = scmp.eq.s32.totalorder %s2913_s16, 0  ;;  %p184_p2 = scmp.ne.s32.totalorder %s2762_s28, %s2758_s27 }
  0x1a   : > { %p256_p5 = scmp.eq.s32.totalorder %s1876_s17, 7  ;;  %p1879_p7 = scmp.ge.s32.totalorder %s2798_s15, 1 }
  0x1b   : > { %p2923_p4 = por %p3702_p1, %p84_p0  ;;  %p2929_p6 = por %p184_p2, %p3702_p1 }
  0x1c   : > { %p2934_p8 = por %p256_p5, %p84_p0  ;;  %p263_p9 = scmp.lt.s32.totalorder %s2798_s15, 9 }
  0x1d   : > { %s3728_s18 = scalar_select %p2923_p4, 1, 0 }
  0x1e   : > { %s3729_s19 = scalar_select %p2929_p6, 1, 0 }
  0x1f   : > { %s3731_s20 = scalar_select %p2934_p8, 1, 0 }
  0x20   : > { %3730 = sst [smem:[#allocation26_spill]] %s3729_s19  ;;  %p2939_p10 = pnand %p1879_p7, %p263_p9 }
  0x21   : > { %3732 = sst [smem:[#allocation27_spill]] %s3731_s20  ;;  %s2800_s22 = smov [#allocation11]  }
  0x22   : > { %s3733_s21 = scalar_select %p2939_p10, 1, 0 }
  0x23   : > { %s284_s23 = sshll.u32 %s2800_s22, 4  ;;  %p2247_p11 = pneg %p2939_p10  ;;  %s285_s23 = int_to_ptr.vmem [resolvable:$true] %s284_s23 }
  0x24   : > { %s2801_s25 = smov [#allocation14]   ;;  %s3735_s3 = sld [smem:[#allocation32_spill]] }
  0x25   : > { %p2947_p12 = pnand %p2247_p11, %p3702_p1  ;;  %s300_s26 = sshll.u32 %s2801_s25, 4  ;;  %s2951_s26 = int_to_ptr.vmem [resolvable:$true] %s300_s26 }
  0x27   : > { %p2961_p0 = pneg %p2947_p12 }
  0x2a   : > { %s2497_s20 = scalar_lea.hbm %s3735_s3, 1024 }
  0x2b   : > { %p2498_p13 = scmp.ne.s32.totalorder %s3735_s3, %s2497_s20  ;;  %p2504_p7 = scmp.lt.u32.totalorder %s2497_s20, %s3735_s3 }
  0x2d   : > { %p2500_p2 = pnand %p2961_p0, %p2498_p13 }
  0x2f   : > { %p2501_p5 = pneg %p2500_p2 }
  0x31   : > { %p2506_p9 = pnand %p2504_p7, %p2501_p5 }
  0x33   : > { %2509 = shalt.err (!%p2506_p9)
}
  0x34   : > { %s2510_s27 = scalar_lea.vmem %s285_s23, 1024  ;;  %p2518_p8 = scmp.lt.s32.totalorder %s285_s23, %s285_s23 }
  0x35   : > { %p2511_p11 = scmp.ne.s32.totalorder %s285_s23, %s2510_s27  ;;  %p2519_p6 = scmp.lt.s32.totalorder %s2510_s27, %s2510_s27 }
  0x37   : > { %p2513_p1 = pnand %p2511_p11, %p2961_p0  ;;  %p2520_p4 = por %p2519_p6, %p2518_p8 }
  0x39   : > { %p2514_p3 = pneg %p2513_p1 }
  0x3b   : > { %p2521_p10 = pnand %p2520_p4, %p2514_p3 }
  0x3d   : > { %2524 = shalt.err (!%p2521_p10)
}
  0x3e   : > { %s3710_s8 = smov 64   ;;  %s3712_s30 = smov 4  }
  0x3f   : > { %2253 = dma.hbm_to_vmem [thread:$0]  (!%p2947_p12), %s3735_s3, 1024, %s285_s23, [#allocation10], %s3710_s8, %s3710_s8, %s3712_s30  }
  0x40   : > { %s3737_s6 = sld [smem:[#allocation34_spill]] }
  0x46   : > { %s2525_s4 = scalar_lea.hbm %s3737_s6, 1024 }
  0x47   : > { %p2526_p1 = scmp.ne.s32.totalorder %s3737_s6, %s2525_s4  ;;  %p2532_p6 = scmp.lt.u32.totalorder %s2525_s4, %s3737_s6 }
  0x49   : > { %p2528_p3 = pnand %p2526_p1, %p2961_p0 }
  0x4b   : > { %p2529_p4 = pneg %p2528_p3 }
  0x4d   : > { %p2534_p8 = pnand %p2532_p6, %p2529_p4 }
  0x4f   : > { %2537 = shalt.err (!%p2534_p8)
}
  0x50   : > { %s2538_s23 = scalar_lea.vmem %s2951_s26, 1024  ;;  %p2546_p5 = scmp.lt.s32.totalorder %s2951_s26, %s2951_s26 }
  0x51   : > { %p2539_p10 = scmp.ne.s32.totalorder %s2951_s26, %s2538_s23  ;;  %p2547_p7 = scmp.lt.s32.totalorder %s2538_s23, %s2538_s23 }
  0x53   : > { %p2541_p13 = pnand %p2539_p10, %p2961_p0  ;;  %p2548_p9 = por %p2547_p7, %p2546_p5 }
  0x55   : > { %p2542_p2 = pneg %p2541_p13 }
  0x57   : > { %p2549_p11 = pnand %p2548_p9, %p2542_p2 }
  0x59   : > { %2552 = shalt.err (!%p2549_p11)
}
  0x5a   : > { %2256 = dma.hbm_to_vmem [thread:$0]  (!%p2947_p12), %s3737_s6, 1024, %s2951_s26, [#allocation13], %s3710_s8, %s3710_s8, %s3712_s30  }
  0x5b   : > { %s3738_s0 = sld [smem:[#allocation30_spill]] }
  0x61   : > { %s2553_s7 = scalar_lea.hbm %s3738_s0, 16 }
  0x62   : > { %p2554_p1 = scmp.ne.s32.totalorder %s3738_s0, %s2553_s7  ;;  %p2560_p6 = scmp.lt.u32.totalorder %s2553_s7, %s3738_s0 }
  0x64   : > { %p2556_p3 = pnand %p2554_p1, %p2961_p0 }
  0x66   : > { %p2557_p4 = pneg %p2556_p3 }
  0x68   : > { %p2562_p8 = pnand %p2560_p6, %p2557_p4 }
  0x6a   : > { %2565 = shalt.err (!%p2562_p8)
}
  0x6b   : > { %s2804_s23 = smov [#allocation4]   ;;  %s71_s22 = sadd.s32 1, %s2778_s10 }
  0x6c   : > { %2250 = dma.hbm_to_smem (!%p2947_p12), %s3738_s0, 16, %s2804_s23, [#allocation7]  }
  0x6d   : > { %s40_s11 = sadd.s32 1, %s2790_s13  ;;  %p78_p0 = scmp.ne.s32.totalorder %s2778_s10, %s2774_s9 }
  0x6e   : > { %p3026_p10 = scmp.ge.s32.totalorder %s40_s11, 2  ;;  %p3715_p13 = scmp.eq.s32.totalorder %s2798_s15, 0 }
  0x6f   : > { %p3740_p2 = scmp.eq.s32.totalorder %s2913_s16, 7  ;;  %p3714_p7 = scmp.lt.s32.totalorder %s2798_s15, 8 }
  0x70   : > { %s3791_s11 = smov (%p3026_p10, %s40_s11), 0  ;;  %p80_p12 = por %p3715_p13, %p78_p0 }
  0x71   : > { %p3033_p5 = por %p3740_p2, %p78_p0  ;;  %3742 = sst [smem:[#allocation28_spill]] %s3791_s11 }
  0x72   : > { %s3045_s19 = sand.u32 1, %s2778_s10   ;;  %s68_s7 = ssub.s32 %s2790_s13, %s3791_s11 }
  0x73   : > { %s3741_s12 = scalar_select %p3033_p5, 1, 0 }
  0x74   : > { %p69_p9 = scmp.eq.s32.totalorder %s68_s7, 0  ;;  %s1884_s20 = sshll.u32 %s3045_s19, 7 }
  0x75   : > { %s1982_s17 = sshll.u32 %s2790_s13, 11  ;;  %s3744_s1 = sld [smem:[#allocation31_spill]] }
  0x76   : > { %s3052_s25 = scalar_select %p69_p9, %s2778_s10, %s71_s22  }
  0x77   : > { %s321_s4 = scalar_lea.vmem [#allocation8], %s1884_s20  ;;  %p3063_p11 = pnand %p3714_p7, %p80_p12 }
  0x78   : > { %3743 = sst [smem:[#allocation29_spill]] %s3052_s25  ;;  %s329_s8 = sshll.u32 %s321_s4, 4  ;;  %s3059_s8 = int_to_ptr.vmem [resolvable:$true] %s329_s8 }
  0x79   : > { %s318_s30 = scalar_lea.sflag [#allocation5], %s3045_s19  ;;  %p2568_p3 = pneg %p3063_p11 }
  0x7b   : > { %s3057_s26 = scalar_lea.hbm %s3744_s1, %s1982_s17  ;;  %s2571_s23 = scalar_lea.hbm %s3744_s1, 4096 }
  0x7c   : > { %s2566_s27 = scalar_lea.hbm %s3057_s26, 2048  ;;  %p2572_p8 = scmp.lt.u32.totalorder %s3057_s26, %s3744_s1 }
  0x7d   : > { %p2567_p1 = scmp.ne.s32.totalorder %s3057_s26, %s2566_s27  ;;  %p2573_p0 = scmp.lt.u32.totalorder %s2571_s23, %s2566_s27 }
  0x7e   : > { %p2575_p12 = scmp.lt.u32.totalorder %s2566_s27, %s3057_s26 }
  0x7f   : > { %p2569_p4 = pnand %p2568_p3, %p2567_p1  ;;  %p2574_p2 = por %p2573_p0, %p2572_p8 }
  0x81   : > { %p2570_p6 = pneg %p2569_p4  ;;  %p2576_p9 = por %p2575_p12, %p2574_p2 }
  0x83   : > { %p2577_p7 = pnand %p2576_p9, %p2570_p6 }
  0x85   : > { %2580 = shalt.err (!%p2577_p7)
}
  0x86   : > { %s2581_s22 = scalar_lea.vmem %s3059_s8, 2048  ;;  %s2805_s20 = smov [#allocation8]  }
  0x87   : > { %p2582_p1 = scmp.ne.s32.totalorder %s3059_s8, %s2581_s22  ;;  %s2586_s17 = sshll.u32 %s2805_s20, 4  ;;  %s2587_s17 = int_to_ptr.vmem [resolvable:$false] %s2586_s17 }
  0x88   : > { %s2588_s0 = scalar_lea.vmem %s2587_s17, 4096  ;;  %p2589_p5 = scmp.lt.s32.totalorder %s3059_s8, %s2587_s17 }
  0x89   : > { %p2584_p4 = pnand %p2582_p1, %p2568_p3  ;;  %p2590_p8 = scmp.lt.s32.totalorder %s2588_s0, %s2581_s22 }
  0x8b   : > { %p2585_p13 = pneg %p2584_p4  ;;  %p2591_p0 = por %p2590_p8, %p2589_p5 }
  0x8d   : > { %p2592_p2 = pnand %p2591_p0, %p2585_p13 }
  0x8f   : > { %2595 = shalt.err (!%p2592_p2)
}
  0x90   : > { %s2806_s27 = smov 128   ;;  %s2807_s23 = smov 8  }
  0x91   : > { %2260 = dma.hbm_to_vmem [thread:$0]  (!%p3063_p11), %s3057_s26, 2048, %s3059_s8, %s318_s30, %s2806_s27, %s2806_s27, %s2807_s23  }
  0x92   : > { %s1888_s4 = sshll.u32 %s3045_s19, 6  ;;  %s1983_s20 = sshll.u32 %s2790_s13, 10 }
  0x93   : > { %s3101_s0 = scalar_lea.hbm %s3692_s2, %s1983_s20  ;;  %s343_s1 = scalar_lea.vmem [#allocation9], %s1888_s4 }
  0x94   : > { %s350_s3 = sshll.u32 %s343_s1, 4  ;;  %s3746_s6 = sand.u32 1, %s2798_s15   ;;  %s3103_s3 = int_to_ptr.vmem [resolvable:$true] %s350_s3 }
  0x95   : > { %s3107_s11 = scalar_lea.sflag [#allocation10], %s3746_s6  ;;  %s2596_s25 = scalar_lea.hbm %s3101_s0, 1024 }
  0x96   : > { %p2597_p13 = scmp.ne.s32.totalorder %s3101_s0, %s2596_s25  ;;  %s2601_s19 = scalar_lea.hbm %s3692_s2, 2048 }
  0x97   : > { %p2602_p6 = scmp.lt.u32.totalorder %s3101_s0, %s3692_s2  ;;  %p2603_p12 = scmp.lt.u32.totalorder %s2601_s19, %s2596_s25 }
  0x98   : > { %p2599_p5 = pnand %p2597_p13, %p2568_p3  ;;  %p2605_p1 = scmp.lt.u32.totalorder %s2596_s25, %s3101_s0 }
  0x99   : > { %p2604_p9 = por %p2603_p12, %p2602_p6 }
  0x9a   : > { %p2600_p7 = pneg %p2599_p5 }
  0x9b   : > { %p2606_p4 = por %p2605_p1, %p2604_p9 }
  0x9d   : > { %p2607_p8 = pnand %p2606_p4, %p2600_p7 }
  0x9f   : > { %2610 = shalt.err (!%p2607_p8)
}
  0xa0   : > { %s2611_s1 = scalar_lea.vmem %s3103_s3, 1024  ;;  %s2808_s6 = smov [#allocation9]  }
  0xa1   : > { %p2612_p0 = scmp.ne.s32.totalorder %s3103_s3, %s2611_s1  ;;  %s2616_s23 = sshll.u32 %s2808_s6, 4  ;;  %s2617_s23 = int_to_ptr.vmem [resolvable:$false] %s2616_s23 }
  0xa2   : > { %s2618_s4 = scalar_lea.vmem %s2617_s23, 2048  ;;  %p2619_p5 = scmp.lt.s32.totalorder %s3103_s3, %s2617_s23 }
  0xa3   : > { %p2614_p2 = pnand %p2612_p0, %p2568_p3  ;;  %p2620_p6 = scmp.lt.s32.totalorder %s2618_s4, %s2611_s1 }
  0xa5   : > { %p2615_p13 = pneg %p2614_p2  ;;  %p2621_p12 = por %p2620_p6, %p2619_p5 }
  0xa7   : > { %p2622_p9 = pnand %p2621_p12, %p2615_p13 }
  0xa9   : > { %2625 = shalt.err (!%p2622_p9)
}
  0xaa   : > { %s3747_s25 = smov 4   ;;  %s3748_s20 = smov 64  }
  0xab   : > { %2263 = dma.hbm_to_vmem [thread:$0]  (!%p3063_p11), %s3101_s0, 1024, %s3103_s3, %s3107_s11, %s3748_s20, %s3748_s20, %s3747_s25  }
  0xac   : > { %s43_s17 = sadd.s32 1, %s2794_s14  ;;  %s1877_s22 = sadd.s32 4294967295, %s2794_s14 }
  0xad   : > { %s3793_s17 = smov (!%p3026_p10, %s43_s17), %s2794_s14  ;;  %p163_p3 = scmp.gt.s32.totalorder %s1877_s22, 0 }
  0xae   : > { %p178_p7 = scmp.ne.s32.totalorder %s2766_s29, %s2762_s28  ;;  %p45_p1 = scmp.ge.s32.totalorder %s3793_s17, 4 }
  0xaf   : > { %s171_s7 = sadd.s32 1, %s2766_s29  ;;  %s3795_s22 = smov (!%p163_p3, %s1877_s22), 0 }
  0xb0   : > { %s3797_s17 = smov (%p45_p1, %s3793_s17), 0  ;;  %p3749_p4 = scmp.eq.s32.totalorder %s2798_s15, 0 }
  0xb1   : > { %s362_s8 = sand.u32 1, %s2766_s29   ;;  %s1878_s30 = sadd.s32 4294967295, %s3797_s17 }
  0xb2   : > { %p180_p8 = por %p178_p7, %p3749_p4  ;;  %s1891_s3 = sshll.u32 %s362_s8, 6 }
  0xb3   : > { %p166_p11 = scmp.gt.s32.totalorder %s1878_s30, 0  ;;  %s1984_s11 = sshll.u32 %s3795_s22, 10 }
  0xb4   : > { %s364_s24 = scalar_lea.vmem [#allocation12], %s1891_s3  ;;  %s3153_s27 = scalar_lea.hbm %s3695_s5, %s1984_s11 }
  0xb5   : > { %s374_s0 = sshll.u32 %s364_s24, 4  ;;  %s3799_s30 = smov (!%p166_p11, %s1878_s30), 0  ;;  %s3161_s0 = int_to_ptr.vmem [resolvable:$true] %s374_s0 }
  0xb6   : > { %s168_s1 = ssub.s32 %s3795_s22, %s3799_s30  ;;  %p3750_p10 = scmp.lt.s32.totalorder %s2798_s15, 8 }
  0xb7   : > { %p169_p2 = scmp.eq.s32.totalorder %s168_s1, 0  ;;  %s3752_s4 = sand.u32 1, %s2798_s15  }
  0xb8   : > { %p3157_p0 = pnand %p3750_p10, %p180_p8  ;;  %s3168_s8 = scalar_lea.sflag [#allocation13], %s3752_s4 }
  0xb9   : > { %s3164_s23 = scalar_select %p169_p2, %s2766_s29, %s171_s7  }
  0xba   : > { %s2626_s3 = scalar_lea.hbm %s3153_s27, 1024  ;;  %p2628_p5 = pneg %p3157_p0 }
  0xbb   : > { %p2627_p13 = scmp.ne.s32.totalorder %s3153_s27, %s2626_s3  ;;  %s2631_s11 = scalar_lea.hbm %s3695_s5, 3072 }
  0xbc   : > { %p2632_p9 = scmp.lt.u32.totalorder %s3153_s27, %s3695_s5  ;;  %p2633_p3 = scmp.lt.u32.totalorder %s2631_s11, %s2626_s3 }
  0xbd   : > { %p2629_p6 = pnand %p2628_p5, %p2627_p13  ;;  %p2635_p1 = scmp.lt.u32.totalorder %s2626_s3, %s3153_s27 }
  0xbe   : > { %p2634_p7 = por %p2633_p3, %p2632_p9 }
  0xbf   : > { %p2630_p12 = pneg %p2629_p6 }
  0xc0   : > { %p2636_p4 = por %p2635_p1, %p2634_p7 }
  0xc2   : > { %p2637_p8 = pnand %p2636_p4, %p2630_p12 }
  0xc4   : > { %2640 = shalt.err (!%p2637_p8)
}
  0xc5   : > { %s2641_s7 = scalar_lea.vmem %s3161_s0, 1024  ;;  %s2809_s26 = smov [#allocation12]  }
  0xc6   : > { %p2642_p11 = scmp.ne.s32.totalorder %s3161_s0, %s2641_s7  ;;  %s2646_s1 = sshll.u32 %s2809_s26, 4  ;;  %s2647_s1 = int_to_ptr.vmem [resolvable:$false] %s2646_s1 }
  0xc7   : > { %s2648_s4 = scalar_lea.vmem %s2647_s1, 2048  ;;  %p2649_p13 = scmp.lt.s32.totalorder %s3161_s0, %s2647_s1 }
  0xc8   : > { %p2644_p10 = pnand %p2642_p11, %p2628_p5  ;;  %p2650_p6 = scmp.lt.s32.totalorder %s2648_s4, %s2641_s7 }
  0xca   : > { %p2645_p2 = pneg %p2644_p10  ;;  %p2651_p9 = por %p2650_p6, %p2649_p13 }
  0xcc   : > { %p2652_p3 = pnand %p2651_p9, %p2645_p2 }
  0xce   : > { %2655 = shalt.err (!%p2652_p3)
}
  0xcf   : > { %2266 = dma.hbm_to_vmem [thread:$0]  (!%p3157_p0), %s3153_s27, 1024, %s3161_s0, %s3168_s8, %s3748_s20, %s3748_s20, %s3747_s25  }
  0xd0   : > { %p3753_p5 = scmp.ne.s32.totalorder %s3733_s21, 0 }
  0xd1   : > { %p3754_p12 = scmp.eq.s32.totalorder (!%p3753_p5), %s2913_s16, 0 }
  0xd2   : > { %386 = sbr.rel (%p3753_p5) target bundleno = 1718 (0x6b6), region = 52 }
  0xd9   : > { %2729 = dma.done.wait (%p3754_p12), [#allocation7], 16   ;;  %p3755_p7 = pmov %p3754_p12 }
  0xda   : > { %s3206_s3 = sand.u32 1, %s2774_s9   ;;  %p3756_p0 = scmp.ne.s32.totalorder %s3728_s18, 0 }
  0xdb   : > { %2731 = vsyncadd (%p3755_p7), [#allocation7], 4294967280  ;;  %s1897_s6 = sshll.u32 %s3206_s3, 7  ;;  %s393_s22 = scalar_lea.sflag [#allocation5], %s3206_s3 }
  0xdc   : > { %s3210_s30 = scalar_lea.vmem [#allocation8], %s1897_s6 }
  0xdd   : > { %2733 = dma.done.wait (%p3756_p0), %s393_s22, 2048  }
  0xde   : > { %2735 = vsyncadd (%p3756_p0), %s393_s22, 4294965248  ;;  %s401_s21 = sand.u32 1, %s2913_s16   ;;  %s1898_s25 = sshll.u32 %s3206_s3, 6 }
  0xdf   : > { %s402_s20 = scalar_lea.sflag [#allocation10], %s401_s21  ;;  %s3218_s0 = scalar_lea.vmem [#allocation9], %s1898_s25 }
  0xe0   : > { %2737 = dma.done.wait (%p3756_p0), %s402_s20, 1024  }
  0xe1   : > { %2739 = vsyncadd (%p3756_p0), %s402_s20, 4294966272  ;;  %p3757_p1 = pmov %p3755_p7 }
  0xe3   : > { %2741 = dma.done.wait (%p3757_p1), [#allocation10], 1024   ;;  %p3758_p4 = pmov %p3757_p1 }
  0xe4   : > { %s3759_s27 = sld [smem:[#allocation26_spill]]  ;;  %s416_s8 = sand.u32 1, %s2762_s28  }
  0xe5   : > { %2743 = vsyncadd (%p3758_p4), [#allocation10], 4294966272  ;;  %s1900_s11 = sshll.u32 %s416_s8, 6  ;;  %s415_s24 = scalar_lea.sflag [#allocation13], %s401_s21 }
  0xe6   : > { %s3229_s19 = scalar_lea.vmem [#allocation12], %s1900_s11 }
  0xea   : > { %p3760_p8 = scmp.ne.s32.totalorder %s3759_s27, 0 }
  0xec   : > { %2745 = dma.done.wait (%p3760_p8), %s415_s24, 1024  }
  0xed   : > { %2747 = vsyncadd (%p3760_p8), %s415_s24, 4294966272  ;;  %p3761_p11 = pmov %p3757_p1 }
  0xee   : > { %p3762_p10 = pmov %p3757_p1 }
  0xef   : > { %2749 = dma.done.wait (%p3761_p11), [#allocation13], 1024  }
  0xf0   : > { %2751 = vsyncadd (%p3762_p10), [#allocation13], 4294966272 }
  0xf1   : > { %427 = sfence }
  0xf2   : > { %s3763_s18 = sld [smem:[#allocation24_spill]]  ;;  %s3242_s26 = scalar_lea.vmem [#allocation15], %s1897_s6 }
  0xf3   : > { %s3764_s1 = sld [smem:[#allocation25_spill]] }
  0xf8   : > { %s3240_s7 = sshll.u32 %s3763_s18, 7 }
  0xf9   : > { %p1904_p2 = scmp.ne.s32.totalorder %s3764_s1, 0 }
  0xfa   : > { %v2377_v0 = vld [vmem:[#allocation11] sm:$0xff] (!%p1904_p2)   ;;  %v2378_v1 = vld [vmem:[#allocation11 + $0x8] sm:$0xff] (!%p1904_p2)   ;;  %v2379_v2 = vld [vmem:[#allocation11 + $0x10] sm:$0xff] (!%p1904_p2)   ;;  %s3765_s6 = sld [smem:[#allocation33_spill]] (!%p1904_p2)  ;;  %s734_s22 = sshra.s32 (!%p1904_p2), %s3240_s7, 4 }
  0xfb   : > { %477 = sbr.rel (%p1904_p2) target bundleno = 516 (0x204), region = 80  ;;  %2099 = vmatprep.subr.bf16.mxu0 (!%p1904_p2), %v2377_v0  ;;  %2195 = vmatprep.subr.bf16.mxu1 (!%p1904_p2), %v2377_v0  ;;  %v2380_v3 = vld [vmem:[#allocation11 + $0x18] sm:$0xff] (!%p1904_p2)   ;;  %v2385_v4 = vld [vmem:[%s3218_s0] sm:$0xff] (!%p1904_p2)   ;;  %v2382_v7 = vld [vmem:[#allocation11 + $0x28] sm:$0xff] (!%p1904_p2)   ;;  %s3261_s21 = sshll.u32 (!%p1904_p2), %s734_s22, 3 }
  0xfc   : > { %2100 = vmatpush3.bf16.msra.mxu0 (!%p1904_p2), %v2377_v0  ;;  %2203 = vmatpush3.bf16.msra.mxu1 (!%p1904_p2), %v2377_v0  ;;  %v2386_v5 = vld [vmem:[%s3218_s0 + $0x20] sm:$0xff] (!%p1904_p2)   ;;  %v2383_v8 = vld [vmem:[#allocation11 + $0x30] sm:$0xff] (!%p1904_p2)   ;;  %v2384_v9 = vld [vmem:[#allocation11 + $0x38] sm:$0xff] (!%p1904_p2)   ;;  %s3270_s25 = scalar_lea.vmem (!%p1904_p2), [#allocation2], %s3261_s21  ;;  %s3281_s20 = scalar_lea.vmem (!%p1904_p2), [#allocation3], %s3261_s21 }
  0xfd   : > { %2101 = vmatprep.subr.bf16.mxu0 (!%p1904_p2), %v2378_v1  ;;  %2196 = vmatprep.subr.bf16.mxu1 (!%p1904_p2), %v2378_v1  ;;  %v2381_v6 = vld [vmem:[#allocation11 + $0x20] sm:$0xff] (!%p1904_p2)   ;;  %v2387_v10 = vld [vmem:[%s3218_s0 + $0x8] sm:$0xff] (!%p1904_p2)   ;;  %v2389_v12 = vld [vmem:[%s3218_s0 + $0x10] sm:$0xff] (!%p1904_p2)  }
  0xfe   : > { %2115 = vmatprep.mubr.bf16.mxu0 (!%p1904_p2), %v2385_v4  ;;  %2123 = vmatprep.mubr.bf16.mxu1 (!%p1904_p2), %v2386_v5  ;;  %v2388_v11 = vld [vmem:[%s3218_s0 + $0x28] sm:$0xff] (!%p1904_p2)   ;;  %v2390_v13 = vld [vmem:[%s3218_s0 + $0x30] sm:$0xff] (!%p1904_p2)   ;;  %v2391_v14 = vld [vmem:[%s3218_s0 + $0x18] sm:$0xff] (!%p1904_p2)  }
  0xff   : > { %v2392_v15 = vld [vmem:[%s3218_s0 + $0x38] sm:$0xff] (!%p1904_p2)  }
 0x100   : > { %2102 = vmatpush3.bf16.msra.mxu0 (!%p1904_p2), %v2378_v1  ;;  %2204 = vmatpush3.bf16.msra.mxu1 (!%p1904_p2), %v2378_v1  ;;  %v3256_v16 = vld [vmem:[%s3765_s6] ss:$0 sm:$0xff] (!%p1904_p2) }
 0x101   : > { %2103 = vmatprep.subr.bf16.mxu0 (!%p1904_p2), %v2379_v2  ;;  %2197 = vmatprep.subr.bf16.mxu1 (!%p1904_p2), %v2379_v2 }
 0x104   : > { %2104 = vmatpush3.bf16.msra.mxu0 %v2379_v2  ;;  %2205 = vmatpush3.bf16.msra.mxu1 %v2379_v2 }
 0x105   : > { %2105 = vmatprep.subr.bf16.mxu0 %v2380_v3  ;;  %2198 = vmatprep.subr.bf16.mxu1 %v2380_v3 }
 0x108   : > { %2106 = vmatpush3.bf16.msra.mxu0 %v2380_v3  ;;  %2206 = vmatpush3.bf16.msra.mxu1 %v2380_v3 }
 0x109   : > { %2107 = vmatprep.subr.bf16.mxu0 %v2381_v6  ;;  %2199 = vmatprep.subr.bf16.mxu1 %v2381_v6 }
 0x10c   : > { %2108 = vmatpush3.bf16.msra.mxu0 %v2381_v6  ;;  %2207 = vmatpush3.bf16.msra.mxu1 %v2381_v6 }
 0x10d   : > { %2109 = vmatprep.subr.bf16.mxu0 %v2382_v7  ;;  %2200 = vmatprep.subr.bf16.mxu1 %v2382_v7 }
 0x110   : > { %2110 = vmatpush3.bf16.msra.mxu0 %v2382_v7  ;;  %2208 = vmatpush3.bf16.msra.mxu1 %v2382_v7 }
 0x111   : > { %2111 = vmatprep.subr.bf16.mxu0 %v2383_v8  ;;  %2201 = vmatprep.subr.bf16.mxu1 %v2383_v8 }
 0x114   : > { %2112 = vmatpush3.bf16.msra.mxu0 %v2383_v8  ;;  %2209 = vmatpush3.bf16.msra.mxu1 %v2383_v8 }
 0x115   : > { %2113 = vmatprep.subr.bf16.mxu0 %v2384_v9  ;;  %2202 = vmatprep.subr.bf16.mxu1 %v2384_v9 }
 0x118   : > { %2114 = vmatpush3.bf16.msra.mxu0 %v2384_v9  ;;  %2210 = vmatpush3.bf16.msra.mxu1 %v2384_v9 }
 0x11b   : > { %2116 = vmatmul.mubr.bf16.vlgmr.msra.gmra.mrb[0].mxu0 %v2387_v10  ;;  %2124 = vmatmul.mubr.bf16.vlgmr.msra.gmra.mrb[0].mxu1 %v2388_v11 }
 0x11c   : > { %2119 = vmatprep.mubr.bf16.mxu0 %v2389_v12  ;;  %2127 = vmatprep.mubr.bf16.mxu1 %v2390_v13 }
 0x123   : > { %2120 = vmatmul.mubr.bf16.gmra.mrb[4].mxu0 %v2391_v14  ;;  %2128 = vmatmul.mubr.bf16.gmra.mrb[4].mxu1 %v2392_v15 }
 0x1ee   : > { %v2117_v17 = vpop.f32.mrb[0].mxu0  ;;  %v2125_v18 = vpop.f32.mrb[0].mxu1 }
 0x1ef   : > { %v656_v19 = vadd.f32 %v2117_v17, %v3256_v16  ;;  %v688_v20 = vadd.f32 %v2125_v18, %v3256_v16  ;;  %v647_v21 = vpop.f32.mrb[1].mxu0  ;;  %v679_v22 = vpop.f32.mrb[1].mxu1 }
 0x1f0   : > { %v648_v23 = vadd.f32 %v3256_v16, %v647_v21  ;;  %v680_v24 = vadd.f32 %v3256_v16, %v679_v22  ;;  %v2118_v25 = vpop.f32.mrb[2].mxu0  ;;  %v2126_v26 = vpop.f32.mrb[2].mxu1 }
 0x1f1   : > { %v712_v27 = vmax.f32 %v656_v19, 0.0  ;;  %v720_v28 = vmax.f32 %v688_v20, 0.0  ;;  %v659_v29 = vadd.f32 %v2118_v25, %v3256_v16  ;;  %v691_v30 = vadd.f32 %v2126_v26, %v3256_v16  ;;  %v650_v31 = vpop.f32.mrb[3].mxu0  ;;  %v682_v32 = vpop.f32.mrb[3].mxu1 }
 0x1f2   : > { %v710_v33 = vmax.f32 %v648_v23, 0.0  ;;  %v718_v34 = vmax.f32 %v680_v24, 0.0  ;;  %v651_v35 = vadd.f32 %v3256_v16, %v650_v31  ;;  %v683_v36 = vadd.f32 %v3256_v16, %v682_v32 }
 0x1f3   : > { %v748_v37 = vmul.f32 0.1, %v712_v27  ;;  %v756_v38 = vmul.f32 0.1, %v720_v28  ;;  %v713_v39 = vmax.f32 %v659_v29, 0.0  ;;  %v721_v40 = vmax.f32 %v691_v30, 0.0 }
 0x1f4   : > { %v746_v41 = vmul.f32 0.1, %v710_v33  ;;  %v754_v42 = vmul.f32 0.1, %v718_v34  ;;  %v711_v43 = vmax.f32 %v651_v35, 0.0  ;;  %v719_v44 = vmax.f32 %v683_v36, 0.0 }
 0x1f5   : > { %v727_v45 = vpack.c.bf16 %v713_v39, %v712_v27  ;;  %v749_v46 = vmul.f32 0.1, %v713_v39  ;;  %v731_v47 = vpack.c.bf16 %v721_v40, %v720_v28  ;;  %v757_v48 = vmul.f32 0.1, %v721_v40 }
 0x1f6   : > { %v726_v49 = vpack.c.bf16 %v711_v43, %v710_v33  ;;  %v747_v50 = vmul.f32 0.1, %v711_v43  ;;  %v730_v51 = vpack.c.bf16 %v719_v44, %v718_v34  ;;  %v755_v52 = vmul.f32 0.1, %v719_v44  ;;  %v2121_v53 = vpop.f32.mrb[4].mxu0  ;;  %v2129_v54 = vpop.f32.mrb[4].mxu1 }
 0x1f7   : > { %739 = vst [vmem:[%s3270_s25 + $0x8] sm:$0xff] %v727_v45  ;;  %v763_v55 = vpack.c.bf16 %v749_v46, %v748_v37  ;;  %743 = vst [vmem:[%s3270_s25 + $0x28] sm:$0xff] %v731_v47  ;;  %v767_v56 = vpack.c.bf16 %v757_v48, %v756_v38  ;;  %v672_v57 = vadd.f32 %v2121_v53, %v3256_v16  ;;  %v663_v59 = vpop.f32.mrb[5].mxu0  ;;  %v695_v60 = vpop.f32.mrb[5].mxu1 }
 0x1f8   : > { %v704_v58 = vadd.f32 %v2129_v54, %v3256_v16  ;;  %738 = vst [vmem:[%s3270_s25] sm:$0xff] %v726_v49  ;;  %v762_v61 = vpack.c.bf16 %v747_v50, %v746_v41  ;;  %742 = vst [vmem:[%s3270_s25 + $0x20] sm:$0xff] %v730_v51  ;;  %v766_v62 = vpack.c.bf16 %v755_v52, %v754_v42  ;;  %v2122_v1 = vpop.f32.mrb[6].mxu0  ;;  %v2130_v2 = vpop.f32.mrb[6].mxu1 }
 0x1f9   : > { %v664_v63 = vadd.f32 %v3256_v16, %v663_v59  ;;  %v696_v0 = vadd.f32 %v3256_v16, %v695_v60  ;;  %773 = vst [vmem:[%s3281_s20 + $0x8] sm:$0xff] %v763_v55  ;;  %777 = vst [vmem:[%s3281_s20 + $0x28] sm:$0xff] %v767_v56  ;;  %v716_v3 = vmax.f32 %v672_v57, 0.0  ;;  %v675_v5 = vadd.f32 %v2122_v1, %v3256_v16  ;;  %v666_v7 = vpop.f32.mrb[7].mxu0  ;;  %v698_v8 = vpop.f32.mrb[7].mxu1 }
 0x1fa   : > { %v724_v4 = vmax.f32 %v704_v58, 0.0  ;;  %v707_v6 = vadd.f32 %v2130_v2, %v3256_v16  ;;  %772 = vst [vmem:[%s3281_s20] sm:$0xff] %v762_v61  ;;  %776 = vst [vmem:[%s3281_s20 + $0x20] sm:$0xff] %v766_v62  ;;  %v667_v11 = vadd.f32 %v3256_v16, %v666_v7  ;;  %v699_v12 = vadd.f32 %v3256_v16, %v698_v8 }
 0x1fb   : > { %v714_v9 = vmax.f32 %v664_v63, 0.0  ;;  %v722_v10 = vmax.f32 %v696_v0, 0.0  ;;  %v752_v13 = vmul.f32 0.1, %v716_v3  ;;  %v717_v15 = vmax.f32 %v675_v5, 0.0 }
 0x1fc   : > { %v760_v14 = vmul.f32 0.1, %v724_v4  ;;  %v725_v17 = vmax.f32 %v707_v6, 0.0  ;;  %v715_v20 = vmax.f32 %v667_v11, 0.0  ;;  %v723_v21 = vmax.f32 %v699_v12, 0.0 }
 0x1fd   : > { %v750_v18 = vmul.f32 0.1, %v714_v9  ;;  %v758_v19 = vmul.f32 0.1, %v722_v10  ;;  %v729_v22 = vpack.c.bf16 %v717_v15, %v716_v3  ;;  %v753_v23 = vmul.f32 0.1, %v717_v15 }
 0x1fe   : > { %v733_v24 = vpack.c.bf16 %v725_v17, %v724_v4  ;;  %v761_v25 = vmul.f32 0.1, %v725_v17  ;;  %v728_v16 = vpack.c.bf16 %v715_v20, %v714_v9  ;;  %v751_v26 = vmul.f32 0.1, %v715_v20 }
 0x1ff   : > { %v732_v27 = vpack.c.bf16 %v723_v21, %v722_v10  ;;  %v759_v28 = vmul.f32 0.1, %v723_v21  ;;  %741 = vst [vmem:[%s3270_s25 + $0x18] sm:$0xff] %v729_v22  ;;  %v765_v29 = vpack.c.bf16 %v753_v23, %v752_v13 }
 0x200   : > { %745 = vst [vmem:[%s3270_s25 + $0x38] sm:$0xff] %v733_v24  ;;  %v769_v30 = vpack.c.bf16 %v761_v25, %v760_v14  ;;  %740 = vst [vmem:[%s3270_s25 + $0x10] sm:$0xff] %v728_v16  ;;  %v764_v31 = vpack.c.bf16 %v751_v26, %v750_v18 }
 0x201   : > { %744 = vst [vmem:[%s3270_s25 + $0x30] sm:$0xff] %v732_v27  ;;  %v768_v32 = vpack.c.bf16 %v759_v28, %v758_v19  ;;  %775 = vst [vmem:[%s3281_s20 + $0x18] sm:$0xff] %v765_v29 }
 0x202   : > { %779 = vst [vmem:[%s3281_s20 + $0x38] sm:$0xff] %v769_v30  ;;  %774 = vst [vmem:[%s3281_s20 + $0x10] sm:$0xff] %v764_v31 }
 0x203   : > { %778 = vst [vmem:[%s3281_s20 + $0x30] sm:$0xff] %v768_v32 }
 0x204 PF: > { %s3766_s0 = sld [smem:[#allocation25_spill]] }
 0x20a   : > { %p1924_p13 = scmp.le.s32.totalorder %s3766_s0, 0 }
 0x20b   : > { %s3767_s27 = sld [smem:[#allocation25_spill]] (!%p1924_p13)  ;;  %v2395_v33 = vld [vmem:[%s3210_s30 + $0x4] ss:$8 sps:$4 sm:$0xff] (!%p1924_p13)   ;;  %v2419_v42 = vld [vmem:[%s3229_s19 + $0x10] sm:$0xff] (!%p1924_p13)   ;;  %v2420_v44 = vld [vmem:[%s3229_s19 + $0x18] sm:$0xff] (!%p1924_p13)   ;;  %s844_s22 = sshra.s32 (!%p1924_p13), %s3240_s7, 4 }
 0x20c   : > { %783 = sbr.rel (%p1924_p13) target bundleno = 1072 (0x430), region = 84  ;;  %984 = vmatprep.mubr.bf16.mxu0 (!%p1924_p13), %v2395_v33  ;;  %v2417_v34 = vld [vmem:[%s3229_s19] sm:$0xff] (!%p1924_p13)   ;;  %v2418_v35 = vld [vmem:[%s3229_s19 + $0x8] sm:$0xff] (!%p1924_p13)   ;;  %v2396_v55 = vld [vmem:[%s3210_s30 + $0x14] ss:$8 sps:$4 sm:$0xff] (!%p1924_p13)   ;;  %s1933_s21 = sshll.u32 (!%p1924_p13), %s844_s22, 3 }
 0x20d   : > { %2131 = vmatprep.subr.bf16.mxu1 (!%p1924_p13), %v2417_v34  ;;  %v2393_v54 = vld [vmem:[%s3210_s30] ss:$8 sps:$4 sm:$0xff] (!%p1924_p13)   ;;  %v2398_v56 = vld [vmem:[%s3210_s30 + $0x10] ss:$8 sps:$4 sm:$0xff] (!%p1924_p13)   ;;  %v2399_v57 = vld [vmem:[%s3210_s30 + $0x24] ss:$8 sps:$4 sm:$0xff] (!%p1924_p13)  }
 0x20e   : > { %2132 = vmatpush3.bf16.msra.mxu1 (!%p1924_p13), %v2417_v34  ;;  %v2401_v58 = vld [vmem:[%s3210_s30 + $0x20] ss:$8 sps:$4 sm:$0xff] (!%p1924_p13)   ;;  %v2402_v59 = vld [vmem:[%s3210_s30 + $0x34] ss:$8 sps:$4 sm:$0xff] (!%p1924_p13)   ;;  %v2404_v60 = vld [vmem:[%s3210_s30 + $0x30] ss:$8 sps:$4 sm:$0xff] (!%p1924_p13)  }
 0x20f   : > { %2133 = vmatprep.subr.bf16.mxu1 (!%p1924_p13), %v2418_v35  ;;  %v2405_v61 = vld [vmem:[%s3210_s30 + $0x44] ss:$8 sps:$4 sm:$0xff] (!%p1924_p13)   ;;  %v2407_v62 = vld [vmem:[%s3210_s30 + $0x40] ss:$8 sps:$4 sm:$0xff] (!%p1924_p13)   ;;  %v2408_v63 = vld [vmem:[%s3210_s30 + $0x54] ss:$8 sps:$4 sm:$0xff] (!%p1924_p13)  }
 0x210   : > { %v2410_v0 = vld [vmem:[%s3210_s30 + $0x50] ss:$8 sps:$4 sm:$0xff] (!%p1924_p13)   ;;  %v2411_v1 = vld [vmem:[%s3210_s30 + $0x64] ss:$8 sps:$4 sm:$0xff] (!%p1924_p13)   ;;  %v2413_v2 = vld [vmem:[%s3210_s30 + $0x60] ss:$8 sps:$4 sm:$0xff] (!%p1924_p13)  }
 0x211   : > { %s784_s8 = sadd.s32 (!%p1924_p13), 1, %s3767_s27  ;;  %v2414_v3 = vld [vmem:[%s3210_s30 + $0x74] ss:$8 sps:$4 sm:$0xff] (!%p1924_p13)   ;;  %v2416_v4 = vld [vmem:[%s3210_s30 + $0x70] ss:$8 sps:$4 sm:$0xff] (!%p1924_p13)   ;;  %v2421_v5 = vld [vmem:[%s3229_s19 + $0x20] sm:$0xff] (!%p1924_p13)  }
 0x212   : > { %p785_p6 = scmp.lt.s32.totalorder (!%p1924_p13), %s784_s8, 0  ;;  %s786_s11 = ssub.s32 (!%p1924_p13), 0, %s784_s8  ;;  %2134 = vmatpush3.bf16.msra.mxu1 (!%p1924_p13), %v2418_v35  ;;  %v2422_v6 = vld [vmem:[%s3229_s19 + $0x28] sm:$0xff] (!%p1924_p13)   ;;  %v2423_v7 = vld [vmem:[%s3229_s19 + $0x30] sm:$0xff] (!%p1924_p13)   ;;  %v2424_v8 = vld [vmem:[%s3229_s19 + $0x38] sm:$0xff] (!%p1924_p13)  }
 0x213   : > { %s1925_s24 = smin.u32 %s786_s11, %s784_s8  ;;  %2135 = vmatprep.subr.bf16.mxu1 %v2419_v42  ;;  %s3346_s25 = scalar_lea.vmem [#allocation3], %s1933_s21 }
 0x214   : > { %s788_s18 = sand.u32 1, %s1925_s24   ;;  %v848_v9 = vld [vmem:[%s3346_s25] sm:$0xff]  ;;  %v849_v21 = vld [vmem:[%s3346_s25 + $0x8] sm:$0xff]  ;;  %v850_v32 = vld [vmem:[%s3346_s25 + $0x10] sm:$0xff]  ;;  %s798_s30 = ssub.s32 0, %s3767_s27 }
 0x215   : > { %s789_s1 = ssub.s32 0, %s788_s18  ;;  %v856_v14 = vunpack.c.l.bf16 %v848_v9  ;;  %v857_v15 = vunpack.c.h.bf16 %v848_v9  ;;  %v858_v25 = vunpack.c.l.bf16 %v849_v21  ;;  %v859_v27 = vunpack.c.h.bf16 %v849_v21  ;;  %s1928_s19 = smin.u32 %s3767_s27, %s798_s30 }
 0x216   : > { %s3801_s1 = smov (!%p785_p6, %s789_s1), %s788_s18  ;;  %2136 = vmatpush3.bf16.msra.mxu1 %v2419_v42  ;;  %s800_s20 = sand.u32 1, %s1928_s19  }
 0x217   : > { %p1927_p9 = scmp.lt.s32.totalorder %s3801_s1, 0  ;;  %s795_s16 = sadd.s32 2, %s3801_s1  ;;  %2137 = vmatprep.subr.bf16.mxu1 %v2420_v44 }
 0x218   : > { %p797_p3 = scmp.lt.s32.totalorder %s3767_s27, 0  ;;  %s801_s0 = ssub.s32 0, %s800_s20 }
 0x219   : > { %s3803_s16 = smov (!%p1927_p9, %s795_s16), %s3801_s1  ;;  %s1073_s8 = sld [smem:[#allocation4 + %s3767_s27]] }
 0x21a   : > { %s1985_s4 = sshll.u32 %s3803_s16, 7  ;;  %2138 = vmatpush3.bf16.msra.mxu1 %v2420_v44  ;;  %v851_v44 = vld [vmem:[%s3346_s25 + $0x18] sm:$0xff]  ;;  %s3805_s0 = smov (!%p797_p3, %s801_s0), %s800_s20 }
 0x21b   : > { %s3304_s6 = scalar_lea.vmem [#allocation2], %s1985_s4  ;;  %2139 = vmatprep.subr.bf16.mxu1 %v2421_v5  ;;  %p1930_p5 = scmp.lt.s32.totalorder %s3805_s0, 0 }
 0x21c   : > { %v836_v36 = vld [vmem:[%s3304_s6 + $0x40] sm:$0xff]  ;;  %v837_v38 = vld [vmem:[%s3304_s6 + $0x48] sm:$0xff]  ;;  %v838_v40 = vld [vmem:[%s3304_s6 + $0x50] sm:$0xff]  ;;  %s807_s11 = sadd.s32 2, %s3805_s0 }
 0x21d   : > { %v828_v37 = vld [vmem:[%s3304_s6] sm:$0xff]  ;;  %2003 = vmatprep.subr.bf16.mxu0 %v836_v36  ;;  %v829_v39 = vld [vmem:[%s3304_s6 + $0x8] sm:$0xff]  ;;  %v830_v41 = vld [vmem:[%s3304_s6 + $0x10] sm:$0xff]  ;;  %v860_v36 = vunpack.c.l.bf16 %v850_v32  ;;  %s3807_s11 = smov (!%p1930_p5, %s807_s11), %s3805_s0 }
 0x21e   : > { %2004 = vmatpush3.bf16.msra.mxu0 %v828_v37  ;;  %v839_v43 = vld [vmem:[%s3304_s6 + $0x58] sm:$0xff]  ;;  %v840_v46 = vld [vmem:[%s3304_s6 + $0x60] sm:$0xff]  ;;  %v841_v48 = vld [vmem:[%s3304_s6 + $0x68] sm:$0xff]  ;;  %2140 = vmatpush3.bf16.msra.mxu1 %v2421_v5  ;;  %s1958_s24 = sshll.u32 %s3807_s11, 4 }
 0x21f   : > { %2005 = vmatprep.subr.bf16.mxu0 %v837_v38  ;;  %v831_v45 = vld [vmem:[%s3304_s6 + $0x18] sm:$0xff]  ;;  %v832_v47 = vld [vmem:[%s3304_s6 + $0x20] sm:$0xff]  ;;  %v833_v49 = vld [vmem:[%s3304_s6 + $0x28] sm:$0xff]  ;;  %2141 = vmatprep.subr.bf16.mxu1 %v2422_v6  ;;  %s1261_s18 = sadd.s32 %s1958_s24, %s844_s22 }
 0x220   : > { %v842_v50 = vld [vmem:[%s3304_s6 + $0x70] sm:$0xff]  ;;  %v843_v52 = vld [vmem:[%s3304_s6 + $0x78] sm:$0xff]  ;;  %s1959_s27 = sshll.u32 %s1261_s18, 3 }
 0x221   : > { %v834_v51 = vld [vmem:[%s3304_s6 + $0x30] sm:$0xff]  ;;  %v835_v53 = vld [vmem:[%s3304_s6 + $0x38] sm:$0xff]  ;;  %s3420_s1 = scalar_lea.vmem [#allocation2], %s1959_s27 }
 0x222   : > { %2006 = vmatpush3.bf16.msra.mxu0 %v829_v39  ;;  %2142 = vmatpush3.bf16.msra.mxu1 %v2422_v6  ;;  %v861_v39 = vunpack.c.h.bf16 %v850_v32  ;;  %v855_v32 = vld [vmem:[%s3346_s25 + $0x38] sm:$0xff] }
 0x223   : > { %2007 = vmatprep.subr.bf16.mxu0 %v838_v40  ;;  %2143 = vmatprep.subr.bf16.mxu1 %v2423_v7 }
 0x226   : > { %2008 = vmatpush3.bf16.msra.mxu0 %v830_v41  ;;  %2144 = vmatpush3.bf16.msra.mxu1 %v2423_v7 }
 0x227   : > { %2009 = vmatprep.subr.bf16.mxu0 %v839_v43  ;;  %2145 = vmatprep.subr.bf16.mxu1 %v2424_v8 }
 0x22a   : > { %2010 = vmatpush3.bf16.msra.mxu0 %v831_v45  ;;  %2146 = vmatpush3.bf16.msra.mxu1 %v2424_v8 }
 0x22b   : > { %2011 = vmatprep.subr.bf16.mxu0 %v840_v46 }
 0x22e   : > { %2012 = vmatpush3.bf16.msra.mxu0 %v832_v47 }
 0x22f   : > { %2013 = vmatprep.subr.bf16.mxu0 %v841_v48  ;;  %v862_v48 = vunpack.c.l.bf16 %v851_v44 }
 0x232   : > { %2014 = vmatpush3.bf16.msra.mxu0 %v833_v49 }
 0x233   : > { %2015 = vmatprep.subr.bf16.mxu0 %v842_v50 }
 0x236   : > { %2016 = vmatpush3.bf16.msra.mxu0 %v834_v51  ;;  %v863_v51 = vunpack.c.h.bf16 %v851_v44 }
 0x237   : > { %2017 = vmatprep.subr.bf16.mxu0 %v843_v52 }
 0x23a   : > { %2018 = vmatpush3.bf16.msra.mxu0 %v835_v53 }
 0x23d   : > { %985 = vmatmul.mubr.bf16.vlgmr.msra.gmra.mrb[0].mxu0 %v2393_v54 }
 0x23e   : > { %992 = vmatprep.mubr.bf16.mxu0 %v2396_v55 }
 0x245   : > { %993 = vmatmul.mubr.bf16.gmra.mrb[4].mxu0 %v2398_v56  ;;  %v852_v56 = vld [vmem:[%s3346_s25 + $0x20] sm:$0xff] }
 0x246   : > { %1000 = vmatprep.mubr.bf16.mxu0 %v2399_v57 }
 0x24d   : > { %1001 = vmatmul.mubr.bf16.gmra.mrb[8].mxu0 %v2401_v58 }
 0x24e   : > { %1008 = vmatprep.mubr.bf16.mxu0 %v2402_v59 }
 0x255   : > { %1009 = vmatmul.mubr.bf16.gmra.mrb[12].mxu0 %v2404_v60  ;;  %v864_v60 = vunpack.c.l.bf16 %v852_v56 }
 0x256   : > { %1016 = vmatprep.mubr.bf16.mxu0 %v2405_v61 }
 0x25d   : > { %1017 = vmatmul.mubr.bf16.gmra.mrb[16].mxu0 %v2407_v62 }
 0x25e   : > { %1024 = vmatprep.mubr.bf16.mxu0 %v2408_v63  ;;  %v865_v63 = vunpack.c.h.bf16 %v852_v56 }
 0x265   : > { %1025 = vmatmul.mubr.bf16.gmra.mrb[20].mxu0 %v2410_v0 }
 0x266   : > { %1032 = vmatprep.mubr.bf16.mxu0 %v2411_v1 }
 0x26d   : > { %1033 = vmatmul.mubr.bf16.gmra.mrb[24].mxu0 %v2413_v2 }
 0x26e   : > { %1040 = vmatprep.mubr.bf16.mxu0 %v2414_v3 }
 0x275   : > { %1041 = vmatmul.mubr.bf16.gmra.mrb[28].mxu0 %v2416_v4  ;;  %v853_v4 = vld [vmem:[%s3346_s25 + $0x28] sm:$0xff] }
 0x276   : > { %v866_v8 = vunpack.c.l.bf16 %v853_v4 }
 0x310   : > { %v2019_v10 = vpop.f32.mrb[0].mxu0 }
 0x311   : > { %v2020_v11 = vpop.f32.mrb[1].mxu0 }
 0x312   : > { %v2021_v12 = vadd.f32 %v2020_v11, %v2019_v10  ;;  %v2022_v13 = vpop.f32.mrb[2].mxu0  ;;  %v867_v11 = vunpack.c.h.bf16 %v853_v4 }
 0x313   : > { %v2023_v17 = vpop.f32.mrb[3].mxu0 }
 0x314   : > { %v2024_v18 = vadd.f32 %v2023_v17, %v2022_v13  ;;  %v3349_v19 = vadd.f32 %v2021_v12, %v856_v14  ;;  %v854_v17 = vld [vmem:[%s3346_s25 + $0x30] sm:$0xff] }
 0x316   : > { %v3351_v20 = vadd.f32 %v2024_v18, %v857_v15 }
 0x318   : > { %v2025_v22 = vpop.f32.mrb[4].mxu0  ;;  %v1049_v23 = vpack.c.bf16 %v3351_v20, %v3349_v19 }
 0x319   : > { %v2026_v24 = vpop.f32.mrb[5].mxu0 }
 0x31a   : > { %v2027_v16 = vadd.f32 %v2026_v24, %v2025_v22  ;;  %v2028_v26 = vpop.f32.mrb[6].mxu0  ;;  %2147 = vmatprep.mubr.bf16.mxu1 %v1049_v23  ;;  %v868_v23 = vunpack.c.l.bf16 %v854_v17 }
 0x31b   : > { %v2029_v28 = vpop.f32.mrb[7].mxu0 }
 0x31c   : > { %v2030_v29 = vadd.f32 %v2029_v28, %v2028_v26  ;;  %v3356_v30 = vadd.f32 %v2027_v16, %v858_v25  ;;  %v869_v16 = vunpack.c.h.bf16 %v854_v17 }
 0x31e   : > { %v3358_v31 = vadd.f32 %v2030_v29, %v859_v27 }
 0x320   : > { %v2031_v33 = vpop.f32.mrb[8].mxu0  ;;  %v1050_v34 = vpack.c.bf16 %v3358_v31, %v3356_v30 }
 0x321   : > { %v2032_v35 = vpop.f32.mrb[9].mxu0 }
 0x322   : > { %v2033_v37 = vadd.f32 %v2032_v35, %v2031_v33  ;;  %v2034_v38 = vpop.f32.mrb[10].mxu0  ;;  %2148 = vmatmul.mubr.bf16.vlgmr.msra.gmra.mrb[0].mxu1 %v1050_v34 }
 0x323   : > { %v2035_v40 = vpop.f32.mrb[11].mxu0 }
 0x324   : > { %v2036_v41 = vadd.f32 %v2035_v40, %v2034_v38  ;;  %v3363_v42 = vadd.f32 %v2033_v37, %v860_v36  ;;  %v870_v36 = vunpack.c.l.bf16 %v855_v32 }
 0x326   : > { %v3365_v43 = vadd.f32 %v2036_v41, %v861_v39  ;;  %v871_v39 = vunpack.c.h.bf16 %v855_v32 }
 0x328   : > { %v2037_v45 = vpop.f32.mrb[12].mxu0  ;;  %v1051_v46 = vpack.c.bf16 %v3365_v43, %v3363_v42 }
 0x329   : > { %v2038_v47 = vpop.f32.mrb[13].mxu0 }
 0x32a   : > { %v2039_v49 = vadd.f32 %v2038_v47, %v2037_v45  ;;  %v2040_v50 = vpop.f32.mrb[14].mxu0  ;;  %2151 = vmatprep.mubr.bf16.mxu1 %v1051_v46  ;;  %v3408_v47 = vstv %s1073_s8 }
 0x32b   : > { %v2041_v52 = vpop.f32.mrb[15].mxu0  ;;  %v1079_v4 = vmul.f32 %v3408_v47, %v3363_v42 }
 0x32c   : > { %v2042_v53 = vadd.f32 %v2041_v52, %v2040_v50  ;;  %v3370_v54 = vadd.f32 %v2039_v49, %v862_v48  ;;  %v1077_v48 = vmul.f32 %v3408_v47, %v3356_v30  ;;  %v1075_v50 = vmul.f32 %v3408_v47, %v3349_v19 }
 0x32e   : > { %v3372_v55 = vadd.f32 %v2042_v53, %v863_v51  ;;  %v1078_v53 = vmul.f32 %v3408_v47, %v3358_v31  ;;  %v1081_v31 = vmul.f32 %v3408_v47, %v3370_v54 }
 0x330   : > { %v2043_v57 = vpop.f32.mrb[16].mxu0  ;;  %v1052_v58 = vpack.c.bf16 %v3372_v55, %v3370_v54 }
 0x331   : > { %v2044_v59 = vpop.f32.mrb[17].mxu0 }
 0x332   : > { %v2045_v61 = vadd.f32 %v2044_v59, %v2043_v57  ;;  %v2046_v62 = vpop.f32.mrb[18].mxu0  ;;  %2152 = vmatmul.mubr.bf16.gmra.mrb[4].mxu1 %v1052_v58  ;;  %v1076_v58 = vmul.f32 %v3408_v47, %v3351_v20 }
 0x333   : > { %v2047_v0 = vpop.f32.mrb[19].mxu0 }
 0x334   : > { %v2048_v1 = vadd.f32 %v2047_v0, %v2046_v62  ;;  %v3377_v2 = vadd.f32 %v2045_v61, %v864_v60 }
 0x336   : > { %v3379_v3 = vadd.f32 %v2048_v1, %v865_v63 }
 0x338   : > { %v2049_v5 = vpop.f32.mrb[20].mxu0  ;;  %v1053_v6 = vpack.c.bf16 %v3379_v3, %v3377_v2  ;;  %v1084_v32 = vmul.f32 %v3408_v47, %v3379_v3 }
 0x339   : > { %v2050_v7 = vpop.f32.mrb[21].mxu0 }
 0x33a   : > { %v2051_v9 = vadd.f32 %v2050_v7, %v2049_v5  ;;  %v2052_v10 = vpop.f32.mrb[22].mxu0  ;;  %2155 = vmatprep.mubr.bf16.mxu1 %v1053_v6  ;;  %v1082_v7 = vmul.f32 %v3408_v47, %v3372_v55 }
 0x33b   : > { %v2053_v12 = vpop.f32.mrb[23].mxu0 }
 0x33c   : > { %v2054_v13 = vadd.f32 %v2053_v12, %v2052_v10  ;;  %v3384_v14 = vadd.f32 %v2051_v9, %v866_v8  ;;  %v1080_v10 = vmul.f32 %v3408_v47, %v3365_v43 }
 0x33e   : > { %v3386_v15 = vadd.f32 %v2054_v13, %v867_v11 }
 0x340   : > { %v2055_v18 = vpop.f32.mrb[24].mxu0  ;;  %v1054_v21 = vpack.c.bf16 %v3386_v15, %v3384_v14 }
 0x341   : > { %v2056_v22 = vpop.f32.mrb[25].mxu0 }
 0x342   : > { %v2057_v24 = vadd.f32 %v2056_v22, %v2055_v18  ;;  %v2058_v25 = vpop.f32.mrb[26].mxu0  ;;  %2156 = vmatmul.mubr.bf16.gmra.mrb[8].mxu1 %v1054_v21 }
 0x343   : > { %v2059_v26 = vpop.f32.mrb[27].mxu0 }
 0x344   : > { %v2060_v27 = vadd.f32 %v2059_v26, %v2058_v25  ;;  %v3391_v28 = vadd.f32 %v2057_v24, %v868_v23  ;;  %v1085_v23 = vmul.f32 %v3408_v47, %v3384_v14  ;;  %v1083_v24 = vmul.f32 %v3408_v47, %v3377_v2 }
 0x346   : > { %v3393_v29 = vadd.f32 %v2060_v27, %v869_v16  ;;  %v1086_v16 = vmul.f32 %v3408_v47, %v3386_v15 }
 0x348   : > { %v2061_v33 = vpop.f32.mrb[28].mxu0  ;;  %v1055_v34 = vpack.c.bf16 %v3393_v29, %v3391_v28 }
 0x349   : > { %v2062_v35 = vpop.f32.mrb[29].mxu0 }
 0x34a   : > { %v2063_v37 = vadd.f32 %v2062_v35, %v2061_v33  ;;  %v2064_v38 = vpop.f32.mrb[30].mxu0  ;;  %2159 = vmatprep.mubr.bf16.mxu1 %v1055_v34 }
 0x34b   : > { %v2065_v40 = vpop.f32.mrb[31].mxu0 }
 0x34c   : > { %v2066_v41 = vadd.f32 %v2065_v40, %v2064_v38  ;;  %v3398_v44 = vadd.f32 %v2063_v37, %v870_v36 }
 0x34e   : > { %v3400_v45 = vadd.f32 %v2066_v41, %v871_v39  ;;  %v1089_v40 = vmul.f32 %v3408_v47, %v3398_v44  ;;  %v1087_v41 = vmul.f32 %v3408_v47, %v3391_v28 }
 0x350   : > { %v1056_v46 = vpack.c.bf16 %v3400_v45, %v3398_v44 }
 0x352   : > { %2160 = vmatmul.mubr.bf16.gmra.mrb[12].mxu1 %v1056_v46 }
 0x3f5   : > { %v2149_v49 = vpop.f32.mrb[0].mxu1 }
 0x3f6   : > { %v1182_v51 = vadd.f32 %v2149_v49, %v1077_v48  ;;  %v1173_v52 = vpop.f32.mrb[1].mxu1  ;;  %v1090_v48 = vmul.f32 %v3408_v47, %v3400_v45 }
 0x3f7   : > { %v1174_v56 = vadd.f32 %v1173_v52, %v1075_v50  ;;  %v2150_v57 = vpop.f32.mrb[2].mxu1 }
 0x3f8   : > { %v1185_v59 = vadd.f32 %v2150_v57, %v1078_v53  ;;  %v1176_v60 = vpop.f32.mrb[3].mxu1  ;;  %v1238_v61 = vmax.f32 %v1182_v51, 0.0  ;;  %v1088_v51 = vmul.f32 %v3408_v47, %v3393_v29 }
 0x3f9   : > { %v1177_v30 = vadd.f32 %v1176_v60, %v1076_v58  ;;  %v1236_v63 = vmax.f32 %v1174_v56, 0.0 }
 0x3fa   : > { %v1239_v62 = vmax.f32 %v1185_v59, 0.0 }
 0x3fb   : > { %v1237_v0 = vmax.f32 %v1177_v30, 0.0 }
 0x3fc   : > { %v1253_v1 = vpack.c.bf16 %v1239_v62, %v1238_v61 }
 0x3fd   : > { %v1252_v19 = vpack.c.bf16 %v1237_v0, %v1236_v63 }
 0x3fe   : > { %1265 = vst [vmem:[%s3420_s1 + $0x8] sm:$0xff] %v1253_v1 }
 0x3ff   : > { %1264 = vst [vmem:[%s3420_s1] sm:$0xff] %v1252_v19 }
 0x405   : > { %v2153_v20 = vpop.f32.mrb[4].mxu1 }
 0x406   : > { %v1198_v5 = vadd.f32 %v2153_v20, %v1081_v31  ;;  %v1189_v6 = vpop.f32.mrb[5].mxu1 }
 0x407   : > { %v1190_v8 = vadd.f32 %v1189_v6, %v1079_v4  ;;  %v2154_v9 = vpop.f32.mrb[6].mxu1 }
 0x408   : > { %v1201_v11 = vadd.f32 %v2154_v9, %v1082_v7  ;;  %v1192_v12 = vpop.f32.mrb[7].mxu1  ;;  %v1242_v54 = vmax.f32 %v1198_v5, 0.0 }
 0x409   : > { %v1193_v13 = vadd.f32 %v1192_v12, %v1080_v10  ;;  %v1240_v18 = vmax.f32 %v1190_v8, 0.0 }
 0x40a   : > { %v1243_v17 = vmax.f32 %v1201_v11, 0.0 }
 0x40b   : > { %v1241_v21 = vmax.f32 %v1193_v13, 0.0 }
 0x40c   : > { %v1255_v42 = vpack.c.bf16 %v1243_v17, %v1242_v54 }
 0x40d   : > { %v1254_v22 = vpack.c.bf16 %v1241_v21, %v1240_v18 }
 0x40e   : > { %1267 = vst [vmem:[%s3420_s1 + $0x18] sm:$0xff] %v1255_v42 }
 0x40f   : > { %1266 = vst [vmem:[%s3420_s1 + $0x10] sm:$0xff] %v1254_v22 }
 0x415   : > { %v2157_v55 = vpop.f32.mrb[8].mxu1 }
 0x416   : > { %v1214_v43 = vadd.f32 %v2157_v55, %v1085_v23  ;;  %v1205_v25 = vpop.f32.mrb[9].mxu1 }
 0x417   : > { %v1206_v26 = vadd.f32 %v1205_v25, %v1083_v24  ;;  %v2158_v27 = vpop.f32.mrb[10].mxu1 }
 0x418   : > { %v1217_v33 = vadd.f32 %v2158_v27, %v1086_v16  ;;  %v1208_v34 = vpop.f32.mrb[11].mxu1  ;;  %v1246_v14 = vmax.f32 %v1214_v43, 0.0 }
 0x419   : > { %v1209_v35 = vadd.f32 %v1208_v34, %v1084_v32  ;;  %v1244_v37 = vmax.f32 %v1206_v26, 0.0 }
 0x41a   : > { %v1247_v36 = vmax.f32 %v1217_v33, 0.0 }
 0x41b   : > { %v1245_v38 = vmax.f32 %v1209_v35, 0.0 }
 0x41c   : > { %v1257_v2 = vpack.c.bf16 %v1247_v36, %v1246_v14 }
 0x41d   : > { %v1256_v39 = vpack.c.bf16 %v1245_v38, %v1244_v37 }
 0x41e   : > { %1269 = vst [vmem:[%s3420_s1 + $0x28] sm:$0xff] %v1257_v2 }
 0x41f   : > { %1268 = vst [vmem:[%s3420_s1 + $0x20] sm:$0xff] %v1256_v39 }
 0x425   : > { %v2161_v15 = vpop.f32.mrb[12].mxu1 }
 0x426   : > { %v1230_v3 = vadd.f32 %v2161_v15, %v1089_v40  ;;  %v1221_v46 = vpop.f32.mrb[13].mxu1 }
 0x427   : > { %v1222_v49 = vadd.f32 %v1221_v46, %v1087_v41  ;;  %v2162_v50 = vpop.f32.mrb[14].mxu1 }
 0x428   : > { %v1233_v52 = vadd.f32 %v2162_v50, %v1090_v48  ;;  %v1224_v53 = vpop.f32.mrb[15].mxu1  ;;  %v1250_v44 = vmax.f32 %v1230_v3, 0.0 }
 0x429   : > { %v1225_v56 = vadd.f32 %v1224_v53, %v1088_v51  ;;  %v1248_v58 = vmax.f32 %v1222_v49, 0.0 }
 0x42a   : > { %v1251_v57 = vmax.f32 %v1233_v52, 0.0 }
 0x42b   : > { %v1249_v59 = vmax.f32 %v1225_v56, 0.0 }
 0x42c   : > { %v1259_v28 = vpack.c.bf16 %v1251_v57, %v1250_v44 }
 0x42d   : > { %v1258_v60 = vpack.c.bf16 %v1249_v59, %v1248_v58 }
 0x42e   : > { %1271 = vst [vmem:[%s3420_s1 + $0x38] sm:$0xff] %v1259_v28 }
 0x42f   : > { %1270 = vst [vmem:[%s3420_s1 + $0x30] sm:$0xff] %v1258_v60 }
 0x430 PF: > { %s3768_s16 = sld [smem:[#allocation25_spill]] }
 0x436   : > { %p1960_p12 = scmp.ge.s32.totalorder %s3768_s16, 3 }
 0x437   : > { %v2810_v45 = vmov (!%p1960_p12), 0.0  }
 0x438   : > { %1275 = sbr.rel (%p1960_p12) target bundleno = 1088 (0x440), region = 88  ;;  %1276 = vst [vmem:[%s3242_s26] sm:$0xff] (!%p1960_p12), %v2810_v45  ;;  %1277 = vst [vmem:[%s3242_s26 + $0x8] sm:$0xff] (!%p1960_p12), %v2810_v45 }
 0x439   : > { %1278 = vst [vmem:[%s3242_s26 + $0x10] sm:$0xff] (!%p1960_p12), %v2810_v45  ;;  %1279 = vst [vmem:[%s3242_s26 + $0x18] sm:$0xff] (!%p1960_p12), %v2810_v45 }
 0x43a   : > { %1280 = vst [vmem:[%s3242_s26 + $0x20] sm:$0xff] (!%p1960_p12), %v2810_v45  ;;  %1281 = vst [vmem:[%s3242_s26 + $0x28] sm:$0xff] (!%p1960_p12), %v2810_v45 }
 0x43b   : > { %1282 = vst [vmem:[%s3242_s26 + $0x30] sm:$0xff] (!%p1960_p12), %v2810_v45  ;;  %1283 = vst [vmem:[%s3242_s26 + $0x38] sm:$0xff] (!%p1960_p12), %v2810_v45 }
 0x43c   : > { %1284 = vst [vmem:[%s3242_s26 + $0x40] sm:$0xff] (!%p1960_p12), %v2810_v45  ;;  %1285 = vst [vmem:[%s3242_s26 + $0x48] sm:$0xff] (!%p1960_p12), %v2810_v45 }
 0x43d   : > { %1286 = vst [vmem:[%s3242_s26 + $0x50] sm:$0xff] (!%p1960_p12), %v2810_v45  ;;  %1287 = vst [vmem:[%s3242_s26 + $0x58] sm:$0xff] (!%p1960_p12), %v2810_v45 }
 0x43e   : > { %1288 = vst [vmem:[%s3242_s26 + $0x60] sm:$0xff] (!%p1960_p12), %v2810_v45  ;;  %1289 = vst [vmem:[%s3242_s26 + $0x68] sm:$0xff] (!%p1960_p12), %v2810_v45 }
 0x43f   : > { %1290 = vst [vmem:[%s3242_s26 + $0x70] sm:$0xff] %v2810_v45  ;;  %1291 = vst [vmem:[%s3242_s26 + $0x78] sm:$0xff] %v2810_v45 }
 0x440 PF: > { %s3769_s4 = sld [smem:[#allocation25_spill]] }
 0x446   : > { %p1961_p7 = scmp.ne.s32.totalorder %s3769_s4, 3 }
 0x447   : > { %v2425_v29 = vld [vmem:[#allocation14] sm:$0xff] (!%p1961_p7)   ;;  %s3770_s6 = sld [smem:[#allocation25_spill]] (!%p1961_p7)  ;;  %v2426_v47 = vld [vmem:[#allocation14 + $0x8] sm:$0xff] (!%p1961_p7)   ;;  %v2427_v30 = vld [vmem:[#allocation14 + $0x10] sm:$0xff] (!%p1961_p7)   ;;  %s1308_s20 = sshra.s32 (!%p1961_p7), %s3240_s7, 4  ;;  %v1490_v9 = vlaneseq (!%p1961_p7) }
 0x448   : > { %1295 = sbr.rel (%p1961_p7) target bundleno = 1690 (0x69a), region = 92  ;;  %2163 = vmatprep.subr.bf16.mxu0 (!%p1961_p7), %v2425_v29  ;;  %2211 = vmatprep.subr.bf16.mxu1 (!%p1961_p7), %v2425_v29  ;;  %v2428_v61 = vld [vmem:[#allocation14 + $0x18] sm:$0xff] (!%p1961_p7)   ;;  %v2429_v62 = vld [vmem:[#allocation14 + $0x20] sm:$0xff] (!%p1961_p7)   ;;  %v2430_v1 = vld [vmem:[#allocation14 + $0x28] sm:$0xff] (!%p1961_p7)   ;;  %s3771_s27 = sld [smem:[#allocation35_spill]] (!%p1961_p7) }
 0x449   : > { %2164 = vmatpush3.bf16.msra.mxu0 (!%p1961_p7), %v2425_v29  ;;  %2219 = vmatpush3.bf16.msra.mxu1 (!%p1961_p7), %v2425_v29  ;;  %v2431_v19 = vld [vmem:[#allocation14 + $0x30] sm:$0xff] (!%p1961_p7)   ;;  %v2432_v31 = vld [vmem:[#allocation14 + $0x38] sm:$0xff] (!%p1961_p7)   ;;  %v3486_v10 = vand.u32 (!%p1961_p7), 127, %v1490_v9 }
 0x44a   : > { %2165 = vmatprep.subr.bf16.mxu0 (!%p1961_p7), %v2426_v47  ;;  %2212 = vmatprep.subr.bf16.mxu1 (!%p1961_p7), %v2426_v47 }
 0x44b   : > { %vm1492_vm0 = vcmp.lt.s32.totalorder (!%p1961_p7), %v3486_v10, 8 }
 0x44d   : > { %p1296_p0 = scmp.lt.s32.totalorder (!%p1961_p7), %s3770_s6, 0  ;;  %s1297_s22 = ssub.s32 (!%p1961_p7), 0, %s3770_s6  ;;  %2166 = vmatpush3.bf16.msra.mxu0 (!%p1961_p7), %v2426_v47  ;;  %2220 = vmatpush3.bf16.msra.mxu1 (!%p1961_p7), %v2426_v47 }
 0x44e   : > { %s1962_s21 = smin.u32 (!%p1961_p7), %s3770_s6, %s1297_s22  ;;  %2167 = vmatprep.subr.bf16.mxu0 (!%p1961_p7), %v2427_v30  ;;  %2213 = vmatprep.subr.bf16.mxu1 (!%p1961_p7), %v2427_v30  ;;  %v1967_v11 = vld [vmem:[%s3771_s27] ss:$0 sm:$0xff] (!%p1961_p7) }
 0x44f   : > { %s1299_s25 = sand.u32 1, %s1962_s21  }
 0x450   : > { %s1300_s30 = ssub.s32 0, %s1299_s25 }
 0x451   : > { %s3809_s30 = smov (!%p1296_p0, %s1300_s30), %s1299_s25  ;;  %2168 = vmatpush3.bf16.msra.mxu0 %v2427_v30  ;;  %2221 = vmatpush3.bf16.msra.mxu1 %v2427_v30 }
 0x452   : > { %p1964_p1 = scmp.lt.s32.totalorder %s3809_s30, 0  ;;  %s1306_s19 = sadd.s32 2, %s3809_s30  ;;  %2169 = vmatprep.subr.bf16.mxu0 %v2428_v61  ;;  %2214 = vmatprep.subr.bf16.mxu1 %v2428_v61 }
 0x454   : > { %s3811_s19 = smov (!%p1964_p1, %s1306_s19), %s3809_s30 }
 0x455   : > { %s1965_s0 = sshll.u32 %s3811_s19, 4  ;;  %2170 = vmatpush3.bf16.msra.mxu0 %v2428_v61  ;;  %2222 = vmatpush3.bf16.msra.mxu1 %v2428_v61 }
 0x456   : > { %s1311_s8 = sadd.s32 %s1965_s0, %s1308_s20  ;;  %2171 = vmatprep.subr.bf16.mxu0 %v2429_v62  ;;  %2215 = vmatprep.subr.bf16.mxu1 %v2429_v62 }
 0x457   : > { %s1966_s11 = sshll.u32 %s1311_s8, 3 }
 0x458   : > { %s3476_s24 = scalar_lea.vmem [#allocation2], %s1966_s11 }
 0x459   : > { %v1314_v63 = vld [vmem:[%s3476_s24] sm:$0xff]  ;;  %2172 = vmatpush3.bf16.msra.mxu0 %v2429_v62  ;;  %2223 = vmatpush3.bf16.msra.mxu1 %v2429_v62  ;;  %v1315_v20 = vld [vmem:[%s3476_s24 + $0x8] sm:$0xff]  ;;  %v1316_v5 = vld [vmem:[%s3476_s24 + $0x10] sm:$0xff] }
 0x45a   : > { %v1318_v0 = vld [vmem:[%s3476_s24 + $0x20] sm:$0xff]  ;;  %2179 = vmatprep.mubr.bf16.mxu0 %v1314_v63  ;;  %2173 = vmatprep.subr.bf16.mxu0 %v2430_v1  ;;  %v1319_v4 = vld [vmem:[%s3476_s24 + $0x28] sm:$0xff]  ;;  %v1320_v6 = vld [vmem:[%s3476_s24 + $0x30] sm:$0xff] }
 0x45b   : > { %2187 = vmatprep.mubr.bf16.mxu1 %v1318_v0  ;;  %2216 = vmatprep.subr.bf16.mxu1 %v2430_v1  ;;  %v1317_v7 = vld [vmem:[%s3476_s24 + $0x18] sm:$0xff] }
 0x45c   : > { %v1321_v8 = vld [vmem:[%s3476_s24 + $0x38] sm:$0xff] }
 0x45d   : > { %2174 = vmatpush3.bf16.msra.mxu0 %v2430_v1  ;;  %2224 = vmatpush3.bf16.msra.mxu1 %v2430_v1 }
 0x45e   : > { %2175 = vmatprep.subr.bf16.mxu0 %v2431_v19  ;;  %2217 = vmatprep.subr.bf16.mxu1 %v2431_v19 }
 0x461   : > { %2176 = vmatpush3.bf16.msra.mxu0 %v2431_v19  ;;  %2225 = vmatpush3.bf16.msra.mxu1 %v2431_v19 }
 0x462   : > { %2177 = vmatprep.subr.bf16.mxu0 %v2432_v31  ;;  %2218 = vmatprep.subr.bf16.mxu1 %v2432_v31 }
 0x465   : > { %2178 = vmatpush3.bf16.msra.mxu0 %v2432_v31  ;;  %2226 = vmatpush3.bf16.msra.mxu1 %v2432_v31 }
 0x468   : > { %2180 = vmatmul.mubr.bf16.vlgmr.msra.gmra.mrb[0].mxu0 %v1315_v20  ;;  %2188 = vmatmul.mubr.bf16.vlgmr.msra.gmra.mrb[0].mxu1 %v1319_v4 }
 0x469   : > { %2183 = vmatprep.mubr.bf16.mxu0 %v1316_v5  ;;  %2191 = vmatprep.mubr.bf16.mxu1 %v1320_v6 }
 0x470   : > { %2184 = vmatmul.mubr.bf16.gmra.mrb[4].mxu0 %v1317_v7  ;;  %2192 = vmatmul.mubr.bf16.gmra.mrb[4].mxu1 %v1321_v8 }
 0x53b   : > { %v2181_v12 = vpop.f32.mrb[0].mxu0  ;;  %v2189_v13 = vpop.f32.mrb[0].mxu1 }
 0x53c   : > { %v1436_v54 = vadd.f32 %v2181_v12, %v1967_v11  ;;  %v1468_v17 = vadd.f32 %v2189_v13, %v1967_v11  ;;  %v1427_v18 = vpop.f32.mrb[1].mxu0  ;;  %v1459_v21 = vpop.f32.mrb[1].mxu1 }
 0x53d   : > { %v2182_v42 = vpop.f32.mrb[2].mxu0  ;;  %v2190_v22 = vpop.f32.mrb[2].mxu1  ;;  %v1428_v23 = vadd.f32 %v1967_v11, %v1427_v18  ;;  %v1460_v26 = vadd.f32 %v1967_v11, %v1459_v21 }
 0x53e   : > { %v1439_v55 = vadd.f32 %v2182_v42, %v1967_v11  ;;  %v1430_v24 = vpop.f32.mrb[3].mxu0  ;;  %v1462_v43 = vpop.f32.mrb[3].mxu1  ;;  %v1503_v25 = vsel %vm1492_vm0, %v1468_v17, -1e+30  ;;  %v1495_v16 = vsel %vm1492_vm0, %v1436_v54, -1e+30  ;;  %v1471_v27 = vadd.f32 %v2190_v22, %v1967_v11 }
 0x53f   : > { %1529 = vmax.xlane.f32.xlu0 %v1503_v25  ;;  %1513 = vmax.xlane.f32.xlu1 %v1495_v16  ;;  %v1493_v33 = vsel %vm1492_vm0, %v1428_v23, -1e+30  ;;  %v1431_v2 = vadd.f32 %v1967_v11, %v1430_v24  ;;  %v1463_v39 = vadd.f32 %v1967_v11, %v1462_v43  ;;  %v1501_v15 = vsel %vm1492_vm0, %v1460_v26, -1e+30 }
 0x540   : > { %v1496_v32 = vsel %vm1492_vm0, %v1439_v55, -1e+30  ;;  %v1504_v40 = vsel %vm1492_vm0, %v1471_v27, -1e+30 }
 0x541   : > { %v1502_v49 = vsel %vm1492_vm0, %v1463_v39, -1e+30  ;;  %v1494_v50 = vsel %vm1492_vm0, %v1431_v2, -1e+30 }
 0x543   : > { %1515 = vmax.xlane.f32.xlu1 %v1496_v32  ;;  %1509 = vmax.xlane.f32.xlu0 %v1493_v33  ;;  %v2185_v34 = vpop.f32.mrb[4].mxu0  ;;  %v2193_v35 = vpop.f32.mrb[4].mxu1 }
 0x544   : > { %v1443_v14 = vpop.f32.mrb[5].mxu0  ;;  %v1475_v36 = vpop.f32.mrb[5].mxu1  ;;  %v1452_v46 = vadd.f32 %v2185_v34, %v1967_v11  ;;  %v1484_v45 = vadd.f32 %v2193_v35, %v1967_v11 }
 0x545   : > { %v2186_v37 = vpop.f32.mrb[6].mxu0  ;;  %v2194_v38 = vpop.f32.mrb[6].mxu1  ;;  %v1444_v53 = vadd.f32 %v1967_v11, %v1443_v14  ;;  %v1476_v44 = vadd.f32 %v1967_v11, %v1475_v36 }
 0x546   : > { %v1446_v41 = vpop.f32.mrb[7].mxu0  ;;  %v1478_v3 = vpop.f32.mrb[7].mxu1  ;;  %v1455_v48 = vadd.f32 %v2186_v37, %v1967_v11  ;;  %v1499_v52 = vsel %vm1492_vm0, %v1452_v46, -1e+30  ;;  %v1487_v29 = vadd.f32 %v2194_v38, %v1967_v11  ;;  %v3532_v30 = vsel %vm1492_vm0, %v1484_v45, -1e+30 }
 0x547   : > { %1531 = vmax.xlane.f32.xlu1 %v1504_v40  ;;  %1525 = vmax.xlane.f32.xlu0 %v1501_v15  ;;  %v1447_v56 = vadd.f32 %v1967_v11, %v1446_v41  ;;  %v1479_v57 = vadd.f32 %v1967_v11, %v1478_v3  ;;  %v1497_v59 = vsel %vm1492_vm0, %v1444_v53, -1e+30  ;;  %v3522_v60 = vsel %vm1492_vm0, %v1476_v44, -1e+30 }
 0x548   : > { %v1500_v51 = vsel %vm1492_vm0, %v1455_v48, -1e+30  ;;  %v3528_v47 = vsel %vm1492_vm0, %v1487_v29, -1e+30 }
 0x549   : > { %v1498_v58 = vsel %vm1492_vm0, %v1447_v56, -1e+30  ;;  %v3518_v28 = vsel %vm1492_vm0, %v1479_v57, -1e+30 }
 0x54b   : > { %1527 = vmax.xlane.f32.xlu1 %v1502_v49  ;;  %1511 = vmax.xlane.f32.xlu0 %v1494_v50 }
 0x54f   : > { %1523 = vmax.xlane.f32.xlu1 %v1500_v51  ;;  %1521 = vmax.xlane.f32.xlu0 %v1499_v52 }
 0x553   : > { %1519 = vmax.xlane.f32.xlu1 %v1498_v58  ;;  %1517 = vmax.xlane.f32.xlu0 %v1497_v59 }
 0x557   : > { %1535 = vmax.xlane.f32.xlu1 %v3518_v28  ;;  %1533 = vmax.xlane.f32.xlu0 %v3522_v60 }
 0x55b   : > { %1539 = vmax.xlane.f32.xlu1 %v3528_v47  ;;  %1537 = vmax.xlane.f32.xlu0 %v3532_v30 }
 0x5cc   : > { %v1530_v61 = vpop.xlane.xlu0 %1529  ;;  %v1514_v62 = vpop.xlane.xlu1 %1513 }
 0x5cd   : > { %v3536_v63 = vsub.f32 %v1495_v16, %v1514_v62  ;;  %v3538_v0 = vsub.f32 %v1503_v25, %v1530_v61 }
 0x5cf   : > { %v1561_v1 = vmul.f32 1.442695, %v3536_v63  ;;  %v1577_v4 = vmul.f32 1.442695, %v3538_v0 }
 0x5d0   : > { %v1516_v19 = vpop.xlane.xlu1 %1515  ;;  %v1510_v31 = vpop.xlane.xlu0 %1509 }
 0x5d1   : > { %v3541_v20 = vsub.f32 %v1496_v32, %v1516_v19  ;;  %2433 = vpow2.f32 %v1561_v1  ;;  %v3544_v5 = vsub.f32 %v1493_v33, %v1510_v31 }
 0x5d3   : > { %v1563_v6 = vmul.f32 1.442695, %v3541_v20  ;;  %v1557_v11 = vmul.f32 1.442695, %v3544_v5 }
 0x5d4   : > { %v1532_v7 = vpop.xlane.xlu1 %1531  ;;  %v1526_v8 = vpop.xlane.xlu0 %1525 }
 0x5d5   : > { %2435 = vpow2.f32 %v1563_v6  ;;  %v3547_v9 = vsub.f32 %v1504_v40, %v1532_v7  ;;  %v3549_v10 = vsub.f32 %v1501_v15, %v1526_v8 }
 0x5d6   : > { %2437 = vpow2.f32 %v1577_v4 }
 0x5d7   : > { %v1579_v12 = vmul.f32 1.442695, %v3547_v9  ;;  %v1573_v17 = vmul.f32 1.442695, %v3549_v10 }
 0x5d8   : > { %v1528_v13 = vpop.xlane.xlu1 %1527  ;;  %v1512_v54 = vpop.xlane.xlu0 %1511 }
 0x5d9   : > { %2439 = vpow2.f32 %v1579_v12  ;;  %v3554_v18 = vsub.f32 %v1502_v49, %v1528_v13  ;;  %v3556_v21 = vsub.f32 %v1494_v50, %v1512_v54 }
 0x5da   : > { %2441 = vpow2.f32 %v1557_v11 }
 0x5db   : > { %v1559_v42 = vmul.f32 1.442695, %v3556_v21  ;;  %v2434_v22 = vpop.eup %2433  ;;  %2443 = vpow2.f32 %v1573_v17  ;;  %v1575_v24 = vmul.f32 1.442695, %v3554_v18 }
 0x5dc   : > { %v1524_v23 = vpop.xlane.xlu1 %1523  ;;  %v1522_v55 = vpop.xlane.xlu0 %1521  ;;  %1593 = vadd.xlane.f32.xlu0 %v2434_v22 }
 0x5dd   : > { %v3560_v43 = vsub.f32 %v1500_v51, %v1524_v23  ;;  %v3562_v25 = vsub.f32 %v1499_v52, %v1522_v55  ;;  %2445 = vpow2.f32 %v1559_v42 }
 0x5de   : > { %2447 = vpow2.f32 %v1575_v24 }
 0x5df   : > { %v2436_v16 = vpop.eup %2435  ;;  %v1569_v26 = vmul.f32 1.442695, %v3562_v25  ;;  %v1571_v34 = vmul.f32 1.442695, %v3560_v43 }
 0x5e0   : > { %v2438_v27 = vpop.eup %2437  ;;  %1595 = vadd.xlane.f32.xlu1 %v2436_v16  ;;  %v1520_v32 = vpop.xlane.xlu1 %1519 }
 0x5e1   : > { %v1518_v33 = vpop.xlane.xlu0 %1517  ;;  %v3566_v35 = vsub.f32 %v1498_v58, %v1520_v32  ;;  %1609 = vadd.xlane.f32.xlu0 %v2438_v27  ;;  %2449 = vpow2.f32 %v1569_v26 }
 0x5e2   : > { %v3568_v14 = vsub.f32 %v1497_v59, %v1518_v33  ;;  %2451 = vpow2.f32 %v1571_v34 }
 0x5e3   : > { %v2440_v36 = vpop.eup %2439  ;;  %v1567_v40 = vmul.f32 1.442695, %v3566_v35 }
 0x5e4   : > { %v1565_v37 = vmul.f32 1.442695, %v3568_v14  ;;  %v2442_v38 = vpop.eup %2441  ;;  %1611 = vadd.xlane.f32.xlu1 %v2440_v36  ;;  %v1536_v2 = vpop.xlane.xlu1 %1535 }
 0x5e5   : > { %v1534_v39 = vpop.xlane.xlu0 %1533  ;;  %v3573_v15 = vsub.f32 %v3518_v28, %v1536_v2  ;;  %1589 = vadd.xlane.f32.xlu0 %v2442_v38  ;;  %v2444_v3 = vpop.eup %2443 }
 0x5e6   : > { %v3576_v41 = vsub.f32 %v3522_v60, %v1534_v39  ;;  %2453 = vpow2.f32 %v1565_v37 }
 0x5e7   : > { %v2446_v48 = vpop.eup %2445  ;;  %2455 = vpow2.f32 %v1567_v40  ;;  %v1583_v51 = vmul.f32 1.442695, %v3573_v15 }
 0x5e8   : > { %v1581_v46 = vmul.f32 1.442695, %v3576_v41  ;;  %v1540_v49 = vpop.xlane.xlu1 %1539  ;;  %1591 = vadd.xlane.f32.xlu1 %v2446_v48  ;;  %v2448_v56 = vpop.eup %2447 }
 0x5e9   : > { %v1538_v50 = vpop.xlane.xlu0 %1537  ;;  %1605 = vadd.xlane.f32.xlu0 %v2444_v3  ;;  %v3584_v53 = vsub.f32 %v3528_v47, %v1540_v49 }
 0x5ea   : > { %v3581_v52 = vsub.f32 %v3532_v30, %v1538_v50  ;;  %2457 = vpow2.f32 %v1581_v46 }
 0x5eb   : > { %v2450_v57 = vpop.eup %2449  ;;  %2459 = vpow2.f32 %v1583_v51  ;;  %v1587_v58 = vmul.f32 1.442695, %v3584_v53 }
 0x5ec   : > { %v1585_v44 = vmul.f32 1.442695, %v3581_v52  ;;  %1607 = vadd.xlane.f32.xlu1 %v2448_v56  ;;  %v2452_v59 = vpop.eup %2451 }
 0x5ed   : > { %1601 = vadd.xlane.f32.xlu0 %v2450_v57 }
 0x5ee   : > { %2461 = vpow2.f32 %v1585_v44 }
 0x5ef   : > { %2463 = vpow2.f32 %v1587_v58 }
 0x5f0   : > { %v2454_v28 = vpop.eup %2453  ;;  %1603 = vadd.xlane.f32.xlu1 %v2452_v59 }
 0x5f1   : > { %1597 = vadd.xlane.f32.xlu0 %v2454_v28  ;;  %v2456_v60 = vpop.eup %2455 }
 0x5f4   : > { %v2458_v45 = vpop.eup %2457  ;;  %1599 = vadd.xlane.f32.xlu1 %v2456_v60 }
 0x5f5   : > { %1613 = vadd.xlane.f32.xlu0 %v2458_v45  ;;  %v2460_v29 = vpop.eup %2459 }
 0x5f8   : > { %v2462_v47 = vpop.eup %2461  ;;  %1615 = vadd.xlane.f32.xlu1 %v2460_v29 }
 0x5f9   : > { %1617 = vadd.xlane.f32.xlu0 %v2462_v47  ;;  %v2464_v30 = vpop.eup %2463 }
 0x5fc   : > { %1619 = vadd.xlane.f32.xlu1 %v2464_v30 }
 0x669   : > { %v1594_v61 = vpop.xlane.xlu0 %1593 }
 0x66a   : > { %2465 = vlog2.f32 %v1594_v61 }
 0x66d   : > { %v1596_v62 = vpop.xlane.xlu1 %1595 }
 0x66e   : > { %2467 = vlog2.f32 %v1596_v62  ;;  %v1610_v1 = vpop.xlane.xlu0 %1609 }
 0x66f   : > { %2469 = vlog2.f32 %v1610_v1 }
 0x671   : > { %v1612_v19 = vpop.xlane.xlu1 %1611 }
 0x672   : > { %2471 = vlog2.f32 %v1612_v19  ;;  %v1590_v31 = vpop.xlane.xlu0 %1589 }
 0x673   : > { %2473 = vlog2.f32 %v1590_v31 }
 0x674   : > { %v2466_v4 = vpop.eup %2465 }
 0x675   : > { %v1626_v6 = vmul.f32 0.6931472, %v2466_v4  ;;  %v1592_v7 = vpop.xlane.xlu1 %1591 }
 0x676   : > { %v1606_v8 = vpop.xlane.xlu0 %1605  ;;  %2475 = vlog2.f32 %v1592_v7 }
 0x677   : > { %v1655_v12 = vsub.f32 %v3536_v63, %v1626_v6  ;;  %2477 = vlog2.f32 %v1606_v8 }
 0x678   : > { %v2468_v11 = vpop.eup %2467 }
 0x679   : > { %v2470_v13 = vpop.eup %2469  ;;  %v1628_v54 = vmul.f32 0.6931472, %v2468_v11  ;;  %1671 = vst [vmem:[%s3242_s26 + $0x10] sm:$0xff] %v1655_v12  ;;  %v1608_v42 = vpop.xlane.xlu1 %1607 }
 0x67a   : > { %v1642_v17 = vmul.f32 0.6931472, %v2470_v13  ;;  %v1602_v22 = vpop.xlane.xlu0 %1601  ;;  %2479 = vlog2.f32 %v1608_v42 }
 0x67b   : > { %v1656_v23 = vsub.f32 %v3541_v20, %v1628_v54  ;;  %2481 = vlog2.f32 %v1602_v22 }
 0x67c   : > { %v2472_v55 = vpop.eup %2471  ;;  %v1663_v24 = vsub.f32 %v3538_v0, %v1642_v17 }
 0x67d   : > { %v2474_v16 = vpop.eup %2473  ;;  %1672 = vst [vmem:[%s3242_s26 + $0x18] sm:$0xff] %v1656_v23  ;;  %v1644_v63 = vmul.f32 0.6931472, %v2472_v55  ;;  %v1604_v27 = vpop.xlane.xlu1 %1603 }
 0x67e   : > { %1679 = vst [vmem:[%s3242_s26 + $0x50] sm:$0xff] %v1663_v24  ;;  %v1622_v26 = vmul.f32 0.6931472, %v2474_v16  ;;  %v1598_v32 = vpop.xlane.xlu0 %1597  ;;  %2483 = vlog2.f32 %v1604_v27 }
 0x67f   : > { %v1664_v33 = vsub.f32 %v3547_v9, %v1644_v63  ;;  %2485 = vlog2.f32 %v1598_v32 }
 0x680   : > { %v1653_v34 = vsub.f32 %v3544_v5, %v1622_v26  ;;  %v2476_v20 = vpop.eup %2475 }
 0x681   : > { %1680 = vst [vmem:[%s3242_s26 + $0x58] sm:$0xff] %v1664_v33  ;;  %v2478_v36 = vpop.eup %2477  ;;  %v1624_v0 = vmul.f32 0.6931472, %v2476_v20  ;;  %v1600_v37 = vpop.xlane.xlu1 %1599 }
 0x682   : > { %1669 = vst [vmem:[%s3242_s26] sm:$0xff] %v1653_v34  ;;  %v1614_v38 = vpop.xlane.xlu0 %1613  ;;  %v1638_v2 = vmul.f32 0.6931472, %v2478_v36  ;;  %2487 = vlog2.f32 %v1600_v37 }
 0x683   : > { %v1654_v39 = vsub.f32 %v3556_v21, %v1624_v0  ;;  %2489 = vlog2.f32 %v1614_v38 }
 0x684   : > { %v2480_v9 = vpop.eup %2479  ;;  %v1661_v40 = vsub.f32 %v3549_v10, %v1638_v2 }
 0x685   : > { %v2482_v5 = vpop.eup %2481  ;;  %1670 = vst [vmem:[%s3242_s26 + $0x8] sm:$0xff] %v1654_v39  ;;  %v1640_v3 = vmul.f32 0.6931472, %v2480_v9  ;;  %v1616_v46 = vpop.xlane.xlu1 %1615 }
 0x686   : > { %v1618_v48 = vpop.xlane.xlu0 %1617  ;;  %1677 = vst [vmem:[%s3242_s26 + $0x40] sm:$0xff] %v1661_v40  ;;  %v1634_v49 = vmul.f32 0.6931472, %v2482_v5  ;;  %2491 = vlog2.f32 %v1616_v46 }
 0x687   : > { %v1662_v50 = vsub.f32 %v3554_v18, %v1640_v3  ;;  %2493 = vlog2.f32 %v1618_v48 }
 0x688   : > { %v2484_v21 = vpop.eup %2483  ;;  %v1659_v51 = vsub.f32 %v3562_v25, %v1634_v49 }
 0x689   : > { %v2486_v56 = vpop.eup %2485  ;;  %1678 = vst [vmem:[%s3242_s26 + $0x48] sm:$0xff] %v1662_v50  ;;  %v1636_v10 = vmul.f32 0.6931472, %v2484_v21  ;;  %v1620_v44 = vpop.xlane.xlu1 %1619 }
 0x68a   : > { %1675 = vst [vmem:[%s3242_s26 + $0x30] sm:$0xff] %v1659_v51  ;;  %v1630_v57 = vmul.f32 0.6931472, %v2486_v56  ;;  %2495 = vlog2.f32 %v1620_v44 }
 0x68b   : > { %v1660_v58 = vsub.f32 %v3560_v43, %v1636_v10 }
 0x68c   : > { %v2488_v59 = vpop.eup %2487  ;;  %v1657_v28 = vsub.f32 %v3568_v14, %v1630_v57 }
 0x68d   : > { %v2490_v18 = vpop.eup %2489  ;;  %1676 = vst [vmem:[%s3242_s26 + $0x38] sm:$0xff] %v1660_v58  ;;  %v1632_v60 = vmul.f32 0.6931472, %v2488_v59 }
 0x68e   : > { %1673 = vst [vmem:[%s3242_s26 + $0x20] sm:$0xff] %v1657_v28  ;;  %v1646_v25 = vmul.f32 0.6931472, %v2490_v18 }
 0x68f   : > { %v1658_v45 = vsub.f32 %v3566_v35, %v1632_v60 }
 0x690   : > { %v2492_v29 = vpop.eup %2491  ;;  %v1665_v47 = vsub.f32 %v3576_v41, %v1646_v25 }
 0x691   : > { %v2494_v30 = vpop.eup %2493  ;;  %1674 = vst [vmem:[%s3242_s26 + $0x28] sm:$0xff] %v1658_v45  ;;  %v1648_v61 = vmul.f32 0.6931472, %v2492_v29 }
 0x692   : > { %1681 = vst [vmem:[%s3242_s26 + $0x60] sm:$0xff] %v1665_v47  ;;  %v1650_v43 = vmul.f32 0.6931472, %v2494_v30 }
 0x693   : > { %v1666_v14 = vsub.f32 %v3573_v15, %v1648_v61 }
 0x694   : > { %v2496_v62 = vpop.eup %2495  ;;  %v1667_v1 = vsub.f32 %v3581_v52, %v1650_v43 }
 0x695   : > { %1682 = vst [vmem:[%s3242_s26 + $0x68] sm:$0xff] %v1666_v14  ;;  %v1652_v19 = vmul.f32 0.6931472, %v2496_v62 }
 0x696   : > { %1683 = vst [vmem:[%s3242_s26 + $0x70] sm:$0xff] %v1667_v1 }
 0x697   : > { %v1668_v31 = vsub.f32 %v3584_v53, %v1652_v19 }
 0x699   : > { %1684 = vst [vmem:[%s3242_s26 + $0x78] sm:$0xff] %v1668_v31 }
 0x69a PF: > { %s3772_s1 = sld [smem:[#allocation24_spill]]  ;;  %s3773_s22 = sld [smem:[#allocation36_spill]] }
 0x69b   : > { %s1699_s25 = sshll.u32 %s3242_s26, 4  ;;  %s1686_s30 = scalar_lea.sflag [#allocation6], %s3206_s3  ;;  %s3627_s25 = int_to_ptr.vmem [resolvable:$true] %s1699_s25 }
 0x69c   : > { %s2656_s19 = scalar_lea.vmem %s3627_s25, 2048  ;;  %p3774_p8 = scmp.ne.s32.totalorder %s3741_s12, 0 }
 0x69d   : > { %p2657_p4 = scmp.ne.s32.totalorder %s3627_s25, %s2656_s19  ;;  %s2811_s20 = smov [#allocation15]  }
 0x69e   : > { %s2660_s0 = sshll.u32 %s2811_s20, 4  ;;  %s2661_s0 = int_to_ptr.vmem [resolvable:$false] %s2660_s0 }
 0x69f   : > { %p2658_p11 = pnand %p2657_p4, %p3774_p8  ;;  %s2662_s8 = scalar_lea.vmem %s2661_s0, 4096 }
 0x6a0   : > { %s1986_s16 = sshll.u32 %s3772_s1, 11  ;;  %p2663_p2 = scmp.lt.s32.totalorder %s3627_s25, %s2661_s0 }
 0x6a1   : > { %s3624_s21 = scalar_lea.hbm %s3773_s22, %s1986_s16  ;;  %p2659_p10 = pneg %p2658_p11 }
 0x6a2   : > { %p2664_p13 = scmp.lt.s32.totalorder %s2662_s8, %s2656_s19 }
 0x6a4   : > { %p2665_p6 = por %p2664_p13, %p2663_p2 }
 0x6a6   : > { %p2666_p9 = pnand %p2665_p6, %p2659_p10 }
 0x6a8   : > { %2669 = shalt.err (!%p2666_p9)
}
 0x6a9   : > { %s2670_s26 = scalar_lea.hbm %s3624_s21, 2048  ;;  %s2674_s7 = scalar_lea.hbm %s3773_s22, 4096 }
 0x6aa   : > { %p2671_p3 = scmp.ne.s32.totalorder %s3624_s21, %s2670_s26  ;;  %p2675_p7 = scmp.lt.u32.totalorder %s3624_s21, %s3773_s22 }
 0x6ab   : > { %p2676_p0 = scmp.lt.u32.totalorder %s2674_s7, %s2670_s26  ;;  %p2678_p4 = scmp.lt.u32.totalorder %s2670_s26, %s3624_s21 }
 0x6ac   : > { %p2672_p5 = pnand %p2671_p3, %p3774_p8 }
 0x6ad   : > { %p2677_p1 = por %p2676_p0, %p2675_p7 }
 0x6ae   : > { %p2673_p12 = pneg %p2672_p5 }
 0x6af   : > { %p2679_p11 = por %p2678_p4, %p2677_p1 }
 0x6b1   : > { %p2680_p10 = pnand %p2679_p11, %p2673_p12 }
 0x6b3   : > { %2683 = shalt.err (!%p2680_p10)
}
 0x6b4   : > { %s2812_s1 = smov 128   ;;  %s2813_s16 = smov 8  }
 0x6b5   : > { %2245 = dma.vmem_to_hbm [thread:$0]  (%p3774_p8), %s3627_s25, 2048, %s3624_s21, %s1686_s30, %s2812_s1, %s2812_s1, %s2813_s16  }
 0x6b6 PF: > { %s3775_s4 = sld [smem:[#allocation23_spill]]  ;;  %s3776_s6 = sld [smem:[#allocation27_spill]] }
 0x6b7   : > { %p2278_p2 = scmp.ge.s32.totalorder %s2798_s15, 2 }
 0x6bc   : > { %s1714_s19 = sand.u32 1, %s3775_s4   ;;  %p3777_p13 = scmp.ne.s32.totalorder %s3776_s6, 0 }
 0x6bd   : > { %s1715_s20 = scalar_lea.sflag [#allocation6], %s1714_s19 }
 0x6be   : > { %p2268_p6 = pnand %p2278_p2, %p3777_p13 }
 0x6c0   : > { %2753 = dma.done.wait (!%p2268_p6), %s1715_s20, 2048  }
 0x6c1   : > { %2755 = vsyncadd (!%p2268_p6), %s1715_s20, 4294965248  ;;  %s31_s15 = sadd.s32 1, %s2798_s15   ;;  %s3778_s12 = sld [smem:[#allocation29_spill]] }
 0x6c2   : > { %p28_p9 = scmp.ge.s32.totalorder %s31_s15, 10   ;;  %s3779_s3 = sld [smem:[#allocation28_spill]] }
 0x6c3   : > { %s3780_s27 = smov %s2762_s28  ;;  %s3781_s28 = smov %s2766_s29 }
 0x6c4   : > { %s3782_s29 = smov %s3164_s23  ;;  %s3783_s30 = smov %s2774_s9 }
 0x6c5   : > { %s3784_s9 = smov %s2778_s10  ;;  %s3786_s11 = smov %s2790_s13 }
 0x6c6   :  { %30 = sbr.rel (!%p28_p9) target bundleno = 22 (0x16), region = 158 }
 0x6c7   : > { %s3785_s10 = smov %s3778_s12  ;;  %s3787_s12 = smov %s2794_s14 }
 0x6c8   : > { %s3788_s13 = smov %s3779_s3  ;;  %s3789_s14 = smov %s3797_s17 }
 0x6cd   :  { %1720 = vsyncpa [#allocation5], 1 }
 0x6ce   :  { %1722 = vsyncpa [#allocation5 + $0x1], 1 }
 0x6cf   :  { %1723 = vsyncpa [#allocation10], 1 }
 0x6d0   :  { %1725 = vsyncpa [#allocation10 + $0x1], 1 }
 0x6d1   :  { %1726 = vsyncpa [#allocation13], 1 }
 0x6d2   :  { %1728 = vsyncpa [#allocation13 + $0x1], 1 }
 0x6d3   :  { %1729 = vsyncpa [#allocation6], 1 }
 0x6d4   :  { %1731 = vsyncpa [#allocation6 + $0x1], 1 }
 0x6d5   :  { %1732 = vsyncpa [#allocation7], 1 }
 0x6d6   :  { %1734 = vsyncpa [#allocation7 + $0x1], 1 }

</bundles_post_ra>
